<compile_context>
chip_gen: v6e
topology: v6e:2x2x1
jax: 0.10.0
libtpu: 0.0.40
codegen_flags: <defaults>
</compile_context>

<pallas_src>
import jax
import jax.numpy as jnp
from jax import lax
from jax.experimental import pallas as pl
from jax.experimental.pallas import tpu as pltpu


def _attention_pool_kernel(q_ref, k_ref, len_ref,       # (TB,1,E), (TB,T,E), (TB,1) VMEM tiles
                           wq_ref, wk_ref, wm_ref,      # (E,H1) x3  VMEM (pre-combined W1)
                           b1_ref,                      # (1,H1) VMEM
                           a1_ref,                      # (1,)   SMEM  (PReLU alpha 1)
                           w2_ref, b2_ref,              # (H1,H2), (1,H2) VMEM
                           a2_ref,                      # (1,)   SMEM  (PReLU alpha 2)
                           wf_ref, bf_ref,              # (1,H2) VMEM, (1,) SMEM
                           out_ref):                    # (TB, E)
    TB, T, E = k_ref.shape
    H1 = wk_ref.shape[1]
    H2 = w2_ref.shape[1]

    q3 = q_ref[...]                                     # (TB, 1, E)
    q2 = q_ref[:, 0, :]                                 # (TB, E)
    k3 = k_ref[...]                                     # (TB, T, E)

    # Per-batch rank-1 query term:  q @ (Wq + Wd) + b1   -> (TB, H1)
    qh = jnp.dot(q2, wq_ref[...], preferred_element_type=jnp.float32) + b1_ref[...]

    # Streamed features (leading-dim merge only; T=8 keeps sublane tiling intact,
    # so the reshapes are layout no-ops).  No lane-axis concatenate.
    k2d = k3.reshape(TB * T, E)                          # (TB*T, E)
    qk2d = (q3 * k3).reshape(TB * T, E)                  # (TB*T, E), query broadcast over T

    # DNN layer 1: two streamed MXU matmuls + broadcast query term, then PReLU.
    h = (jnp.dot(k2d, wk_ref[...], preferred_element_type=jnp.float32)
         + jnp.dot(qk2d, wm_ref[...], preferred_element_type=jnp.float32))   # (TB*T, H1)
    h = h.reshape(TB, T, H1) + qh[:, None, :]
    a1 = a1_ref[0]
    h = jnp.where(h >= 0.0, h, a1 * h)

    # DNN layer 2: Linear + PReLU.
    h = jnp.dot(h.reshape(TB * T, H1), w2_ref[...],
                preferred_element_type=jnp.float32) + b2_ref[...]             # (TB*T, H2)
    a2 = a2_ref[0]
    h = jnp.where(h >= 0.0, h, a2 * h)

    # fc (H2 -> 1) as VPU multiply + lane reduce; dense (TB, T) score tile.
    h3 = h.reshape(TB, T, H2)
    s = jnp.sum(h3 * wf_ref[...], axis=-1) + bf_ref[0]                        # (TB, T)

    # masked softmax over the sequence (lane) axis.
    lens = len_ref[...]                                                       # (TB, 1) int32
    idx = lax.broadcasted_iota(jnp.int32, (TB, T), 1)
    s = jnp.where(idx < lens, s, jnp.float32(-1e30))    # finite "-inf": length==0 stays NaN-free

    m = jnp.max(s, axis=-1, keepdims=True)
    e = jnp.exp(s - m)
    denom = jnp.sum(e, axis=-1, keepdims=True)
    p = e * pl.reciprocal(denom, approx=True)                                 # (TB, T)

    # attention-weighted sum over keys: bmm(score.unsqueeze(1), keys).squeeze(1)
    out = jnp.sum(p[:, :, None] * k3, axis=1)                                 # (TB, E)
    out_ref[...] = out.astype(out_ref.dtype)


def attention_pooling(query, keys, keys_length, params, *, block_b=32):
    """query (B,1,E), keys (B,T,E), keys_length (B,) int -> (B,E)."""
    B, T, E = keys.shape
    w1, b1, a1, w2, b2, a2, wf, bf = params
    H1 = w1.shape[1]
    H2 = w2.shape[1]

    # Fold the broadcast-query blocks of W1 (rows: [Wq; Wk; Wd; Wm]):
    #   x @ W1 = q@(Wq+Wd) + k@(Wk-Wd) + (q*k)@Wm
    wq_comb = w1[:E] + w1[2 * E:3 * E]                   # (E, H1)
    wk_comb = w1[E:2 * E] - w1[2 * E:3 * E]              # (E, H1)
    wm = w1[3 * E:]                                      # (E, H1)
    wf_row = wf.reshape(1, H2)
    bf_s = bf.reshape(-1)[:1]                            # (1,) scalar for SMEM

    # Batch tile: TB*T >= 256 fills the v6e/v7x MXU M dim; keep sublane-aligned splits.
    TB = min(block_b, B)
    if TB < B:
        TB = max(8, (TB // 8) * 8)
    Bp = ((B + TB - 1) // TB) * TB
    if Bp != B:
        pad = Bp - B
        query = jnp.pad(query, ((0, pad), (0, 0), (0, 0)))
        keys = jnp.pad(keys, ((0, pad), (0, 0), (0, 0)))
        keys_length = jnp.pad(keys_length, ((0, pad),))
    len2 = keys_length.astype(jnp.int32).reshape(Bp, 1)

    grid_spec = pltpu.PrefetchScalarGridSpec(
        num_scalar_prefetch=0,
        grid=(Bp // TB,),
        in_specs=[
            pl.BlockSpec((TB, 1, E), lambda i: (i, 0, 0)),        # query
            pl.BlockSpec((TB, T, E), lambda i: (i, 0, 0)),        # keys
            pl.BlockSpec((TB, 1), lambda i: (i, 0)),              # keys_length
            pl.BlockSpec(memory_space=pltpu.MemorySpace.VMEM),    # wq_comb
            pl.BlockSpec(memory_space=pltpu.MemorySpace.VMEM),    # wk_comb
            pl.BlockSpec(memory_space=pltpu.MemorySpace.VMEM),    # wm
            pl.BlockSpec(memory_space=pltpu.MemorySpace.VMEM),    # b1
            pl.BlockSpec(memory_space=pltpu.MemorySpace.SMEM),    # a1 (PReLU alpha)
            pl.BlockSpec(memory_space=pltpu.MemorySpace.VMEM),    # w2
            pl.BlockSpec(memory_space=pltpu.MemorySpace.VMEM),    # b2
            pl.BlockSpec(memory_space=pltpu.MemorySpace.SMEM),    # a2 (PReLU alpha)
            pl.BlockSpec(memory_space=pltpu.MemorySpace.VMEM),    # wf row
            pl.BlockSpec(memory_space=pltpu.MemorySpace.SMEM),    # bf (fc bias)
        ],
        out_specs=pl.BlockSpec((TB, E), lambda i: (i, 0)),
    )

    out = pl.pallas_call(
        _attention_pool_kernel,
        out_shape=jax.ShapeDtypeStruct((Bp, E), keys.dtype),
        grid_spec=grid_spec,
        compiler_params=pltpu.CompilerParams(
            dimension_semantics=("parallel",),      # batch blocks shard across v7x's 2 TCs
            vmem_limit_bytes=32 * 1024 * 1024,      # explicit, safe on v7x's 64 MiB VMEM
        ),
    )(query, keys, len2,
      wq_comb, wk_comb, wm, b1, a1, w2, b2, a2, wf_row, bf_s)
    return out[:B]


def reference(query, keys, keys_length, params):
    """Pure-JAX reference mirroring the PyTorch forward."""
    w1, b1, a1, w2, b2, a2, wf, bf = params
    B, T, E = keys.shape
    q = jnp.broadcast_to(query, (B, T, E))
    x = jnp.concatenate([q, keys, q - keys, q * keys], axis=-1)
    h = x @ w1 + b1
    h = jnp.where(h >= 0, h, a1 * h)
    h = h @ w2 + b2
    h = jnp.where(h >= 0, h, a2 * h)
    s = (h @ wf + bf)[..., 0]                               # (B, T)
    mask = jnp.arange(T)[None, :] < keys_length[:, None]
    s = jnp.where(mask, s, -jnp.inf)
    p = jax.nn.softmax(s, axis=1)
    return jnp.einsum('bt,bte->be', p, keys)


if __name__ == "__main__":
    B, T, E = 64, 8, 32
    hidden_units = (32, 16)   # LocalActivationUnit hidden_units

    key = jax.random.PRNGKey(0)
    ks = jax.random.split(key, 9)

    query = jax.random.normal(ks[0], (B, 1, E), jnp.float32)
    keys = jax.random.normal(ks[1], (B, T, E), jnp.float32)
    keys_length = jax.random.randint(ks[2], (B,), 1, T + 1).astype(jnp.int32)

    # Deterministic synthetic parameters (Linear stored as (in, out) so y = x @ W + b).
    w1 = 0.1 * jax.random.normal(ks[3], (4 * E, hidden_units[0]), jnp.float32)
    b1 = 0.1 * jax.random.normal(ks[4], (1, hidden_units[0]), jnp.float32)
    a1 = jnp.array([0.25], jnp.float32)   # nn.PReLU() default init
    w2 = 0.1 * jax.random.normal(ks[5], (hidden_units[0], hidden_units[1]), jnp.float32)
    b2 = 0.1 * jax.random.normal(ks[6], (1, hidden_units[1]), jnp.float32)
    a2 = jnp.array([0.25], jnp.float32)
    wf = 0.1 * jax.random.normal(ks[7], (hidden_units[1], 1), jnp.float32)
    bf = 0.1 * jax.random.normal(ks[8], (1, 1), jnp.float32)
    params = (w1, b1, a1, w2, b2, a2, wf, bf)

    out = attention_pooling(query, keys, keys_length, params, block_b=32)
    out = jax.block_until_ready(out)

    ref = reference(query, keys, keys_length, params)
    assert out.shape == (B, E)
    # tolerance relaxed slightly for pl.reciprocal(approx=True) + re-associated first matmul
    assert jnp.allclose(out, ref, atol=5e-3, rtol=5e-3), "mismatch vs pure-JAX reference"

    print("KERNEL_OK")
</pallas_src>

<mosaic_0001>
module attributes {stable_mosaic.version = 11 : i64} {
  func.func @_attention_pool_kernel(%arg0: i32, %arg1: memref<32x1x32xf32, #tpu.memory_space<vmem>>, %arg2: memref<32x8x32xf32, #tpu.memory_space<vmem>>, %arg3: memref<32x1xi32, #tpu.memory_space<vmem>>, %arg4: memref<32x32xf32, #tpu.memory_space<vmem>>, %arg5: memref<32x32xf32, #tpu.memory_space<vmem>>, %arg6: memref<32x32xf32, #tpu.memory_space<vmem>>, %arg7: memref<1x32xf32, #tpu.memory_space<vmem>>, %arg8: memref<1xf32, #tpu.memory_space<smem>>, %arg9: memref<32x16xf32, #tpu.memory_space<vmem>>, %arg10: memref<1x16xf32, #tpu.memory_space<vmem>>, %arg11: memref<1xf32, #tpu.memory_space<smem>>, %arg12: memref<1x16xf32, #tpu.memory_space<vmem>>, %arg13: memref<1xf32, #tpu.memory_space<smem>>, %arg14: memref<32x32xf32, #tpu.memory_space<vmem>>) attributes {dimension_semantics = [#tpu.dimension_semantics<parallel>], iteration_bounds = array<i64: 2>, scalar_prefetch = 0 : i64, scratch_operands = 0 : i64, tpu.core_type = #tpu.core_type<tc>, window_params = [{transform_indices = @transform_0, window_bounds = array<i64: 32, 1, 32>}, {transform_indices = @transform_1, window_bounds = array<i64: 32, 8, 32>}, {transform_indices = @transform_2, window_bounds = array<i64: 32, 1>}, {pipeline_mode = #tpu.pipeline_mode<synchronous>, transform_indices = @transform_3, window_bounds = array<i64: 32, 32>}, {pipeline_mode = #tpu.pipeline_mode<synchronous>, transform_indices = @transform_4, window_bounds = array<i64: 32, 32>}, {pipeline_mode = #tpu.pipeline_mode<synchronous>, transform_indices = @transform_5, window_bounds = array<i64: 32, 32>}, {pipeline_mode = #tpu.pipeline_mode<synchronous>, transform_indices = @transform_6, window_bounds = array<i64: 1, 32>}, {transform_indices = @transform_7, window_bounds = array<i64: 1>}, {pipeline_mode = #tpu.pipeline_mode<synchronous>, transform_indices = @transform_8, window_bounds = array<i64: 32, 16>}, {pipeline_mode = #tpu.pipeline_mode<synchronous>, transform_indices = @transform_9, window_bounds = array<i64: 1, 16>}, {transform_indices = @transform_10, window_bounds = array<i64: 1>}, {pipeline_mode = #tpu.pipeline_mode<synchronous>, transform_indices = @transform_11, window_bounds = array<i64: 1, 16>}, {transform_indices = @transform_12, window_bounds = array<i64: 1>}, {transform_indices = @transform_13, window_bounds = array<i64: 32, 32>}]} {
    %c0 = arith.constant 0 : index
    %c0_0 = arith.constant 0 : index
    %c0_1 = arith.constant 0 : index
    %0 = vector.load %arg1[%c0, %c0_0, %c0_1] : memref<32x1x32xf32, #tpu.memory_space<vmem>>, vector<32x1x32xf32>
    %c0_2 = arith.constant 0 : index
    %c0_3 = arith.constant 0 : index
    %c0_4 = arith.constant 0 : index
    %1 = vector.load %arg1[%c0_2, %c0_3, %c0_4] : memref<32x1x32xf32, #tpu.memory_space<vmem>>, vector<32x1x32xf32>
    %2 = vector.shape_cast %1 : vector<32x1x32xf32> to vector<32x32xf32>
    %c0_5 = arith.constant 0 : index
    %c0_6 = arith.constant 0 : index
    %c0_7 = arith.constant 0 : index
    %3 = vector.load %arg2[%c0_5, %c0_6, %c0_7] : memref<32x8x32xf32, #tpu.memory_space<vmem>>, vector<32x8x32xf32>
    %c0_8 = arith.constant 0 : index
    %c0_9 = arith.constant 0 : index
    %4 = vector.load %arg4[%c0_8, %c0_9] : memref<32x32xf32, #tpu.memory_space<vmem>>, vector<32x32xf32>
    %cst = arith.constant dense<0.000000e+00> : vector<32x32xf32>
    %5 = tpu.matmul %2, %4, %cst {dimension_numbers = #tpu.dot_dimension_numbers<[1], [0], [0], [1], [0, 0, 1, 1], [], []>} : vector<32x32xf32>, vector<32x32xf32>, vector<32x32xf32> -> vector<32x32xf32>
    %c0_10 = arith.constant 0 : index
    %c0_11 = arith.constant 0 : index
    %6 = vector.load %arg7[%c0_10, %c0_11] : memref<1x32xf32, #tpu.memory_space<vmem>>, vector<1x32xf32>
    %7 = vector.broadcast %6 : vector<1x32xf32> to vector<32x32xf32>
    %8 = arith.addf %5, %7 : vector<32x32xf32>
    %9 = vector.shape_cast %3 : vector<32x8x32xf32> to vector<256x32xf32>
    %10 = vector.broadcast %0 : vector<32x1x32xf32> to vector<32x8x32xf32>
    %11 = arith.mulf %10, %3 : vector<32x8x32xf32>
    %12 = vector.shape_cast %11 : vector<32x8x32xf32> to vector<256x32xf32>
    %c0_12 = arith.constant 0 : index
    %c0_13 = arith.constant 0 : index
    %13 = vector.load %arg5[%c0_12, %c0_13] : memref<32x32xf32, #tpu.memory_space<vmem>>, vector<32x32xf32>
    %cst_14 = arith.constant dense<0.000000e+00> : vector<256x32xf32>
    %14 = tpu.matmul %9, %13, %cst_14 {dimension_numbers = #tpu.dot_dimension_numbers<[1], [0], [0], [1], [0, 0, 1, 1], [], []>} : vector<256x32xf32>, vector<32x32xf32>, vector<256x32xf32> -> vector<256x32xf32>
    %c0_15 = arith.constant 0 : index
    %c0_16 = arith.constant 0 : index
    %15 = vector.load %arg6[%c0_15, %c0_16] : memref<32x32xf32, #tpu.memory_space<vmem>>, vector<32x32xf32>
    %cst_17 = arith.constant dense<0.000000e+00> : vector<256x32xf32>
    %16 = tpu.matmul %12, %15, %cst_17 {dimension_numbers = #tpu.dot_dimension_numbers<[1], [0], [0], [1], [0, 0, 1, 1], [], []>} : vector<256x32xf32>, vector<32x32xf32>, vector<256x32xf32> -> vector<256x32xf32>
    %17 = arith.addf %14, %16 : vector<256x32xf32>
    %18 = vector.shape_cast %17 : vector<256x32xf32> to vector<32x8x32xf32>
    %19 = vector.shape_cast %8 : vector<32x32xf32> to vector<32x1x32xf32>
    %20 = vector.broadcast %19 : vector<32x1x32xf32> to vector<32x8x32xf32>
    %21 = arith.addf %18, %20 : vector<32x8x32xf32>
    %c0_18 = arith.constant 0 : index
    %22 = memref.load %arg8[%c0_18] : memref<1xf32, #tpu.memory_space<smem>>
    %cst_19 = arith.constant 0.000000e+00 : f32
    %23 = vector.broadcast %cst_19 : f32 to vector<32x8x32xf32>
    %24 = arith.cmpf oge, %21, %23 : vector<32x8x32xf32>
    %25 = vector.broadcast %22 : f32 to vector<32x8x32xf32>
    %26 = arith.mulf %25, %21 : vector<32x8x32xf32>
    %27 = arith.select %24, %21, %26 : vector<32x8x32xi1>, vector<32x8x32xf32>
    %28 = vector.shape_cast %27 : vector<32x8x32xf32> to vector<256x32xf32>
    %c0_20 = arith.constant 0 : index
    %c0_21 = arith.constant 0 : index
    %29 = vector.load %arg9[%c0_20, %c0_21] : memref<32x16xf32, #tpu.memory_space<vmem>>, vector<32x16xf32>
    %cst_22 = arith.constant dense<0.000000e+00> : vector<256x16xf32>
    %30 = tpu.matmul %28, %29, %cst_22 {dimension_numbers = #tpu.dot_dimension_numbers<[1], [0], [0], [1], [0, 0, 1, 1], [], []>} : vector<256x32xf32>, vector<32x16xf32>, vector<256x16xf32> -> vector<256x16xf32>
    %c0_23 = arith.constant 0 : index
    %c0_24 = arith.constant 0 : index
    %31 = vector.load %arg10[%c0_23, %c0_24] : memref<1x16xf32, #tpu.memory_space<vmem>>, vector<1x16xf32>
    %32 = vector.broadcast %31 : vector<1x16xf32> to vector<256x16xf32>
    %33 = arith.addf %30, %32 : vector<256x16xf32>
    %c0_25 = arith.constant 0 : index
    %34 = memref.load %arg11[%c0_25] : memref<1xf32, #tpu.memory_space<smem>>
    %cst_26 = arith.constant 0.000000e+00 : f32
    %35 = vector.broadcast %cst_26 : f32 to vector<256x16xf32>
    %36 = arith.cmpf oge, %33, %35 : vector<256x16xf32>
    %37 = vector.broadcast %34 : f32 to vector<256x16xf32>
    %38 = arith.mulf %37, %33 : vector<256x16xf32>
    %39 = arith.select %36, %33, %38 : vector<256x16xi1>, vector<256x16xf32>
    %40 = vector.shape_cast %39 : vector<256x16xf32> to vector<32x8x16xf32>
    %c0_27 = arith.constant 0 : index
    %c0_28 = arith.constant 0 : index
    %41 = vector.load %arg12[%c0_27, %c0_28] : memref<1x16xf32, #tpu.memory_space<vmem>>, vector<1x16xf32>
    %42 = vector.shape_cast %41 : vector<1x16xf32> to vector<1x1x16xf32>
    %43 = vector.broadcast %42 : vector<1x1x16xf32> to vector<32x8x16xf32>
    %44 = arith.mulf %40, %43 : vector<32x8x16xf32>
    %cst_29 = arith.constant dense<0.000000e+00> : vector<32x8xf32>
    %45 = vector.multi_reduction <add>, %44, %cst_29 [2] : vector<32x8x16xf32> to vector<32x8xf32>
    %c0_30 = arith.constant 0 : index
    %46 = memref.load %arg13[%c0_30] : memref<1xf32, #tpu.memory_space<smem>>
    %47 = vector.broadcast %46 : f32 to vector<32x8xf32>
    %48 = arith.addf %45, %47 : vector<32x8xf32>
    %c0_31 = arith.constant 0 : index
    %c0_32 = arith.constant 0 : index
    %49 = vector.load %arg3[%c0_31, %c0_32] : memref<32x1xi32, #tpu.memory_space<vmem>>, vector<32x1xi32>
    %50 = tpu.iota {dimensions = array<i32: 1>} : vector<32x8xi32>
    %51 = vector.broadcast %49 : vector<32x1xi32> to vector<32x8xi32>
    %52 = arith.cmpi slt, %50, %51 : vector<32x8xi32>
    %cst_33 = arith.constant -1.000000e+30 : f32
    %53 = vector.broadcast %cst_33 : f32 to vector<32x8xf32>
    %54 = arith.select %52, %48, %53 : vector<32x8xi1>, vector<32x8xf32>
    %cst_34 = arith.constant dense<0xFF800000> : vector<32xf32>
    %55 = vector.multi_reduction <maximumf>, %54, %cst_34 [1] : vector<32x8xf32> to vector<32xf32>
    %56 = vector.shape_cast %55 : vector<32xf32> to vector<32x1xf32>
    %57 = vector.broadcast %56 : vector<32x1xf32> to vector<32x8xf32>
    %58 = arith.subf %54, %57 : vector<32x8xf32>
    %59 = math.exp %58 : vector<32x8xf32>
    %cst_35 = arith.constant dense<0.000000e+00> : vector<32xf32>
    %60 = vector.multi_reduction <add>, %59, %cst_35 [1] : vector<32x8xf32> to vector<32xf32>
    %61 = vector.shape_cast %60 : vector<32xf32> to vector<32x1xf32>
    %62 = tpu.reciprocal %61 {approx = true} : vector<32x1xf32> -> vector<32x1xf32>
    %63 = vector.broadcast %62 : vector<32x1xf32> to vector<32x8xf32>
    %64 = arith.mulf %59, %63 : vector<32x8xf32>
    %65 = vector.shape_cast %64 : vector<32x8xf32> to vector<32x8x1xf32>
    %66 = vector.broadcast %65 : vector<32x8x1xf32> to vector<32x8x32xf32>
    %67 = arith.mulf %66, %3 : vector<32x8x32xf32>
    %cst_36 = arith.constant dense<0.000000e+00> : vector<32x32xf32>
    %68 = vector.multi_reduction <add>, %67, %cst_36 [1] : vector<32x8x32xf32> to vector<32x32xf32>
    %c0_37 = arith.constant 0 : index
    %c0_38 = arith.constant 0 : index
    %69 = vector.load %arg14[%c0_37, %c0_38] : memref<32x32xf32, #tpu.memory_space<vmem>>, vector<32x32xf32>
    tpu.vector_store %arg14[%c0_37, %c0_38], %68 {strides = array<i32>} : memref<32x32xf32, #tpu.memory_space<vmem>>, vector<32x32xf32>,
    return
  }
  func.func @transform_0(%arg0: i32) -> (i32, i32, i32) {
    %c0_i32 = arith.constant 0 : i32
    %c0_i32_0 = arith.constant 0 : i32
    %c0_i32_1 = arith.constant 0 : i32
    return %arg0, %c0_i32, %c0_i32_0 : i32, i32, i32
  }
  func.func @transform_1(%arg0: i32) -> (i32, i32, i32) {
    %c0_i32 = arith.constant 0 : i32
    %c0_i32_0 = arith.constant 0 : i32
    %c0_i32_1 = arith.constant 0 : i32
    return %arg0, %c0_i32, %c0_i32_0 : i32, i32, i32
  }
  func.func @transform_2(%arg0: i32) -> (i32, i32) {
    %c0_i32 = arith.constant 0 : i32
    %c0_i32_0 = arith.constant 0 : i32
    return %arg0, %c0_i32 : i32, i32
  }
  func.func @transform_3(%arg0: i32) -> (i32, i32) {
    %c0_i32 = arith.constant 0 : i32
    %c0_i32_0 = arith.constant 0 : i32
    %c0_i32_1 = arith.constant 0 : i32
    return %c0_i32, %c0_i32_0 : i32, i32
  }
  func.func @transform_4(%arg0: i32) -> (i32, i32) {
    %c0_i32 = arith.constant 0 : i32
    %c0_i32_0 = arith.constant 0 : i32
    %c0_i32_1 = arith.constant 0 : i32
    return %c0_i32, %c0_i32_0 : i32, i32
  }
  func.func @transform_5(%arg0: i32) -> (i32, i32) {
    %c0_i32 = arith.constant 0 : i32
    %c0_i32_0 = arith.constant 0 : i32
    %c0_i32_1 = arith.constant 0 : i32
    return %c0_i32, %c0_i32_0 : i32, i32
  }
  func.func @transform_6(%arg0: i32) -> (i32, i32) {
    %c0_i32 = arith.constant 0 : i32
    %c0_i32_0 = arith.constant 0 : i32
    %c0_i32_1 = arith.constant 0 : i32
    return %c0_i32, %c0_i32_0 : i32, i32
  }
  func.func @transform_7(%arg0: i32) -> i32 {
    %c0_i32 = arith.constant 0 : i32
    %c0_i32_0 = arith.constant 0 : i32
    return %c0_i32 : i32
  }
  func.func @transform_8(%arg0: i32) -> (i32, i32) {
    %c0_i32 = arith.constant 0 : i32
    %c0_i32_0 = arith.constant 0 : i32
    %c0_i32_1 = arith.constant 0 : i32
    return %c0_i32, %c0_i32_0 : i32, i32
  }
  func.func @transform_9(%arg0: i32) -> (i32, i32) {
    %c0_i32 = arith.constant 0 : i32
    %c0_i32_0 = arith.constant 0 : i32
    %c0_i32_1 = arith.constant 0 : i32
    return %c0_i32, %c0_i32_0 : i32, i32
  }
  func.func @transform_10(%arg0: i32) -> i32 {
    %c0_i32 = arith.constant 0 : i32
    %c0_i32_0 = arith.constant 0 : i32
    return %c0_i32 : i32
  }
  func.func @transform_11(%arg0: i32) -> (i32, i32) {
    %c0_i32 = arith.constant 0 : i32
    %c0_i32_0 = arith.constant 0 : i32
    %c0_i32_1 = arith.constant 0 : i32
    return %c0_i32, %c0_i32_0 : i32, i32
  }
  func.func @transform_12(%arg0: i32) -> i32 {
    %c0_i32 = arith.constant 0 : i32
    %c0_i32_0 = arith.constant 0 : i32
    return %c0_i32 : i32
  }
  func.func @transform_13(%arg0: i32) -> (i32, i32) {
    %c0_i32 = arith.constant 0 : i32
    %c0_i32_0 = arith.constant 0 : i32
    return %arg0, %c0_i32 : i32, i32
  }
}

</mosaic_0001>

<bundles_post_ra>
// kernel: tpu_custom_call.1
= control target key start
LH: loop header
LB: loop body
LE: loop exit
PB: predicated region body
PF: predicated region fallthrough
CT: control target
= control target key end

     0   :  { %s4284_s14 = smov 0   ;;  %s5466_s0 = inlined_call_operand.vmem [shape: f32[64,1,32], index: 0, kind: input, shape index: {}]   ;;  %s5467_s1 = inlined_call_operand.vmem [shape: f32[64,8,32], index: 1, kind: input, shape index: {}]   ;;  %s5468_s2 = inlined_call_operand.vmem [shape: s32[64,1], index: 2, kind: input, shape index: {}]   ;;  %s5469_s3 = inlined_call_operand.vmem [shape: f32[32,32], index: 3, kind: input, shape index: {}]   ;;  %s5470_s4 = inlined_call_operand.vmem [shape: f32[32,32], index: 4, kind: input, shape index: {}]   ;;  %s5471_s5 = inlined_call_operand.vmem [shape: f32[32,32], index: 5, kind: input, shape index: {}]   ;;  %s5472_s6 = inlined_call_operand.vmem [shape: f32[1,32], index: 6, kind: input, shape index: {}]   ;;  %s5473_s7 = inlined_call_operand.<no memory space> [shape: f32[1], index: 7, kind: input, shape index: {}]   ;;  %s5474_s8 = inlined_call_operand.vmem [shape: f32[32,16], index: 8, kind: input, shape index: {}]   ;;  %s5475_s9 = inlined_call_operand.vmem [shape: f32[1,16], index: 9, kind: input, shape index: {}]   ;;  %s5476_s10 = inlined_call_operand.<no memory space> [shape: f32[1], index: 10, kind: input, shape index: {}]   ;;  %s5477_s11 = inlined_call_operand.vmem [shape: f32[1,16], index: 11, kind: input, shape index: {}]   ;;  %s5478_s12 = inlined_call_operand.<no memory space> [shape: f32[1], index: 12, kind: input, shape index: {}]   ;;  %s5479_s13 = inlined_call_operand.vmem [shape: f32[64,32], index: 13, kind: output, shape index: {}]  }
   0x1   :  { %18 = sst [smem:[#allocation2]] %s5473_s7 }
   0x2   :  { %19 = sst [smem:[#allocation3]] %s5476_s10 }
   0x3   :  { %20 = sst [smem:[#allocation4]] %s5478_s12 }
   0x4 LB: > { %s3712_s15 = sadd.s32 4294967295, %s4201_s14   ;;  %p3716_p0 = scmp.ge.s32.totalorder %s4201_s14, 1  ;;  %s4201_s14 = sphi %s4284_s14, %s26_s14  }
   0x5   : > { %p412_p1 = scmp.lt.s32.totalorder %s4201_s14, 3 }
   0x7   : > { %p413_p2 = pnand %p3716_p0, %p412_p1 }
   0x8   : > { %s3717_s17 = sshll.u32 (!%p413_p2), %s3712_s15, 5  ;;  %s2119_s20 = sld [smem:[#allocation2]] (!%p413_p2) }
   0x9   : > { %416 = sbr.rel (%p413_p2) target bundleno = 1198 (0x4ae), region = 72  ;;  %p466_p3 = scmp.lt.s32.totalorder (!%p413_p2), %s3717_s17, 63 }
   0xa   : > { %s2549_s21 = sld [smem:[#allocation3]] (!%p413_p2)  ;;  %s3720_s26 = sshll.u32 (!%p413_p2), %s3712_s15, 2 }
   0xb   : > { %p477_p4 = scmp.lt.s32.totalorder (!%p413_p2), %s3720_s26, 7  ;;  %s2783_s15 = sld [smem:[#allocation4]] (!%p413_p2) }
   0xe   : > { %v555_v0 = vld [vmem:[%s5469_s3 + $0x18] sm:$0xff]  ;;  %v554_v1 = vld [vmem:[%s5469_s3 + $0x10] sm:$0xff]  ;;  %v602_v2 = vlaneseq  ;;  %v4203_v3 = vmov 1966171168   ;;  %v553_v6 = vld [vmem:[%s5469_s3 + $0x8] sm:$0xff]  ;;  %s5481_s17 = smov (!%p466_p3, %s3717_s17), 63 }
   0xf   : > { %3945 = vmatprep.subr.mxu0 %v555_v0  ;;  %v600_v4 = vunpack.c.l.s4 %v4203_v3  ;;  %v4303_v5 = vld [vmem:[%s5471_s5 + $0x18] sm:$0xff]  ;;  %v4317_v9 = vld [vmem:[%s5471_s5 + $0x10] sm:$0xff]  ;;  %v552_v10 = vld [vmem:[%s5469_s3] sm:$0xff]  ;;  %s4328_s28 = scalar_lea.vmem %s5466_s0, %s5481_s17  ;;  %s3719_s7 = sshll.u32 %s5481_s17, 3  ;;  %vm791_vm0 = vcmask 261120  }
  0x10   : > { %3946 = vmatpush3.msra.mxu0 %v555_v0  ;;  %v4309_v7 = vshrl.u32 %v602_v2, 7  ;;  %4127 = vmatprep.subr.mxu1 %v4303_v5  ;;  %v4336_v12 = vld [vmem:[%s5471_s5 + $0x8] sm:$0xff]  ;;  %v4340_v13 = vld [vmem:[%s4328_s28] sm:$0x1]  ;;  %v4343_v14 = vld [vmem:[%s4328_s28 + $0x1] sm:$0x1]  ;;  %s4502_s19 = scalar_lea.vmem %s5467_s1, %s3719_s7 }
  0x11   : > { %3947 = vmatprep.subr.mxu0 %v554_v1  ;;  %v601_v8 = vunpack.c.0.s8 %v600_v4  ;;  %4131 = vmatpush3.msra.mxu1 %v4303_v5  ;;  %v4346_v15 = vld [vmem:[%s4328_s28 + $0x2] sm:$0x1]  ;;  %v4350_v16 = vld [vmem:[%s4328_s28 + $0x3] sm:$0x1]  ;;  %v4353_v17 = vld [vmem:[%s4328_s28 + $0x4] sm:$0x1]  ;;  %v595_v19 = vcombine.low %v4340_v13, %v4343_v14 }
  0x12   : > { %3948 = vmatpush3.msra.mxu0 %v554_v1  ;;  %4128 = vmatprep.subr.mxu1 %v4317_v9  ;;  %v4356_v18 = vld [vmem:[%s4328_s28 + $0x5] sm:$0x1]  ;;  %v4362_v20 = vld [vmem:[%s4328_s28 + $0x6] sm:$0x1]  ;;  %v4365_v21 = vld [vmem:[%s4328_s28 + $0x7] sm:$0x1]  ;;  %v596_v22 = vcombine.low %v4346_v15, %v4350_v16 }
  0x13   : > { %3949 = vmatprep.subr.mxu0 %v553_v6  ;;  %v4331_v11 = vsub.s32 %v601_v8, %v4309_v7  ;;  %4132 = vmatpush3.msra.mxu1 %v4317_v9  ;;  %v597_v23 = vcombine.low %v4353_v17, %v4356_v18  ;;  %v4372_v24 = vsub.s32 0, %v4309_v7  ;;  %v4377_v25 = vld [vmem:[%s5471_s5] sm:$0xff]  ;;  %v598_v26 = vcombine.low %v4362_v20, %v4365_v21  ;;  %v4384_v28 = vld [vmem:[%s4328_s28 + $0x8] sm:$0x1]  ;;  %v4387_v29 = vld [vmem:[%s4328_s28 + $0x9] sm:$0x1] }
  0x14   : > { %3950 = vmatpush3.msra.mxu0 %v553_v6  ;;  %4129 = vmatprep.subr.mxu1 %v4336_v12  ;;  %v4390_v30 = vld [vmem:[%s4328_s28 + $0xa] sm:$0x1]  ;;  %v4395_v33 = vld [vmem:[%s4328_s28 + $0xb] sm:$0x1]  ;;  %v4398_v34 = vld [vmem:[%s4328_s28 + $0xc] sm:$0x1]  ;;  %v644_v36 = vcombine.low %v4384_v28, %v4387_v29 }
  0x15   : > { %3951 = vmatprep.subr.mxu0 %v552_v10  ;;  %v605_v27 = vrot.slane %v595_v19, %v4331_v11  ;;  %v612_v31 = vrot.slane %v596_v22, %v4331_v11  ;;  %v619_v32 = vrot.slane %v597_v23, %v4331_v11  ;;  %v4401_v35 = vld [vmem:[%s4328_s28 + $0xd] sm:$0x1]  ;;  %4133 = vmatpush3.msra.mxu1 %v4336_v12  ;;  %v4408_v38 = vld [vmem:[%s4328_s28 + $0xe] sm:$0x1]  ;;  %v4411_v39 = vld [vmem:[%s4328_s28 + $0xf] sm:$0x1] }
  0x16   : > { %3952 = vmatpush3.msra.mxu0 %v552_v10  ;;  %v626_v37 = vrot.slane %v598_v26, %v4331_v11  ;;  %v645_v40 = vcombine.low %v4390_v30, %v4395_v33  ;;  %v646_v41 = vcombine.low %v4398_v34, %v4401_v35  ;;  %v4418_v42 = vld [vmem:[%s4328_s28 + $0x10] sm:$0x1]  ;;  %4130 = vmatprep.subr.mxu1 %v4377_v25  ;;  %v4425_v46 = vld [vmem:[%s4328_s28 + $0x11] sm:$0x1]  ;;  %v4428_v47 = vld [vmem:[%s4328_s28 + $0x12] sm:$0x1] }
  0x17   : > { %3959 = vmatprep.subr.mxu0 %v4303_v5  ;;  %v627_v43 = vcombine.low %v605_v27, %v612_v31  ;;  %v647_v44 = vcombine.low %v4408_v38, %v4411_v39  ;;  %v654_v45 = vrot.slane %v644_v36, %v4331_v11  ;;  %v4431_v48 = vld [vmem:[%s4328_s28 + $0x13] sm:$0x1]  ;;  %4134 = vmatpush3.msra.mxu1 %v4377_v25  ;;  %v4437_v52 = vld [vmem:[%s4328_s28 + $0x14] sm:$0x1]  ;;  %v4440_v53 = vld [vmem:[%s4328_s28 + $0x15] sm:$0x1] }
  0x18   : > { %v628_v49 = vcombine.low %v619_v32, %v626_v37  ;;  %v661_v50 = vrot.slane %v645_v40, %v4331_v11  ;;  %v668_v51 = vrot.slane %v646_v41, %v4331_v11  ;;  %v4443_v54 = vld [vmem:[%s4328_s28 + $0x16] sm:$0x1]  ;;  %v693_v55 = vcombine.low %v4418_v42, %v4425_v46  ;;  %v4450_v58 = vld [vmem:[%s4328_s28 + $0x17] sm:$0x1]  ;;  %v4457_v61 = vld [vmem:[%s4328_s28 + $0x18] sm:$0x1] }
  0x19   : > { %v635_v56 = vrot.slane %v627_v43, %v4331_v11  ;;  %v675_v57 = vrot.slane %v647_v44, %v4331_v11  ;;  %v694_v59 = vcombine.low %v4428_v47, %v4431_v48  ;;  %v695_v60 = vcombine.low %v4437_v52, %v4440_v53  ;;  %v4460_v62 = vld [vmem:[%s4328_s28 + $0x19] sm:$0x1]  ;;  %v4467_v4 = vld [vmem:[%s4328_s28 + $0x1a] sm:$0x1]  ;;  %v4470_v6 = vld [vmem:[%s4328_s28 + $0x1b] sm:$0x1] }
  0x1a   : > { %v642_v63 = vrot.slane %v628_v49, %v4331_v11  ;;  %v676_v0 = vcombine.low %v654_v45, %v661_v50  ;;  %v696_v1 = vcombine.low %v4443_v54, %v4450_v58  ;;  %v703_v3 = vrot.slane %v693_v55, %v4331_v11  ;;  %v4473_v8 = vld [vmem:[%s4328_s28 + $0x1c] sm:$0x1]  ;;  %v4478_v23 = vld [vmem:[%s4328_s28 + $0x1d] sm:$0x1]  ;;  %v4481_v26 = vld [vmem:[%s4328_s28 + $0x1e] sm:$0x1] }
  0x1b   : > { %v677_v10 = vcombine.low %v668_v51, %v675_v57  ;;  %v710_v19 = vrot.slane %v694_v59, %v4331_v11  ;;  %v717_v22 = vrot.slane %v695_v60, %v4331_v11  ;;  %v4484_v27 = vld [vmem:[%s4328_s28 + $0x1f] sm:$0x1]  ;;  %v742_v31 = vcombine.low %v4457_v61, %v4460_v62  ;;  %s5483_s26 = smov (!%p477_p4, %s3720_s26), 7 }
  0x1c   : > { %v643_v32 = vcombine.low %v635_v56, %v642_v63  ;;  %v684_v36 = vrot.slane %v676_v0, %v4331_v11  ;;  %v724_v37 = vrot.slane %v696_v1, %v4331_v11  ;;  %v743_v40 = vcombine.low %v4467_v4, %v4470_v6  ;;  %s3721_s27 = sshll.u32 %s5483_s26, 3 }
  0x1d   : > { %v691_v41 = vrot.slane %v677_v10, %v4331_v11  ;;  %v725_v43 = vcombine.low %v703_v3, %v710_v19  ;;  %v744_v44 = vcombine.low %v4473_v8, %v4478_v23  ;;  %v745_v45 = vcombine.low %v4481_v26, %v4484_v27  ;;  %v4515_v3 = vld [vmem:[%s4502_s19] sm:$0xff]  ;;  %s480_s30 = scalar_lea.vmem %s5468_s2, %s3721_s27  ;;  %s5389_s12 = scalar_lea.vmem %s5479_s13, %s3721_s27 }
  0x1e   : > { %3953 = vmatprep.mubr.msk.f32.mxu0 %vm791_vm0, %v643_v32  ;;  %v726_v49 = vcombine.low %v717_v22, %v724_v37  ;;  %v752_v50 = vrot.slane %v742_v31, %v4331_v11  ;;  %v759_v51 = vrot.slane %v743_v40, %v4331_v11  ;;  %v888_v0 = vrot.slane %v4340_v13, %v4372_v24  ;;  %v4524_v13 = vld [vmem:[%s4502_s19 + $0x70] sm:$0xff]  ;;  %v4527_v32 = vld [vmem:[%s4502_s19 + $0x8] sm:$0xff] }
  0x1f   : > { %v692_v55 = vcombine.low %v684_v36, %v691_v41  ;;  %v733_v56 = vrot.slane %v725_v43, %v4331_v11  ;;  %v766_v57 = vrot.slane %v744_v44, %v4331_v11  ;;  %v773_v59 = vrot.slane %v745_v45, %v4331_v11  ;;  %v4538_v40 = vld [vmem:[%s4502_s19 + $0x10] sm:$0xff]  ;;  %v4541_v41 = vld [vmem:[%s4502_s19 + $0x78] sm:$0xff]  ;;  %v4553_v44 = vld [vmem:[%s4502_s19 + $0x80] sm:$0xff] }
  0x20   : > { %v740_v60 = vrot.slane %v726_v49, %v4331_v11  ;;  %v774_v63 = vcombine.low %v752_v50, %v759_v51  ;;  %v892_v22 = vrot.slane %v4343_v14, %v4372_v24  ;;  %v896_v36 = vrot.slane %v4346_v15, %v4372_v24  ;;  %v4561_v49 = vld [vmem:[%s4502_s19 + $0x88] sm:$0xff]  ;;  %v4569_v50 = vld [vmem:[%s4502_s19 + $0x18] sm:$0xff] }
  0x21   : > { %3954 = vmatmul.mubr.msk.f32.vlgmr.msra.gmra.mxu0 %vm791_vm0, %v692_v55  ;;  %v775_v1 = vcombine.low %v766_v57, %v773_v59  ;;  %v944_v14 = vrot.slane %v4408_v38, %v4372_v24  ;;  %v900_v15 = vrot.slane %v4350_v16, %v4372_v24  ;;  %v948_v38 = vrot.slane %v4411_v39, %v4372_v24  ;;  %v4575_v55 = vld [vmem:[%s4502_s19 + $0x20] sm:$0xff]  ;;  %v4587_v57 = vld [vmem:[%s4502_s19 + $0x90] sm:$0xff] }
  0x22   : > { %3960 = vmatpush3.msra.mxu0 %v4303_v5  ;;  %v741_v10 = vcombine.low %v733_v56, %v740_v60  ;;  %v782_v19 = vrot.slane %v774_v63, %v4331_v11  ;;  %v1045_v5 = vmul.f32 %v888_v0, %v4515_v3  ;;  %v1046_v45 = vmul.f32 %v892_v22, %v4527_v32  ;;  %v1079_v56 = vld [vmem:[%s5470_s4 + $0x10] sm:$0xff]  ;;  %v4597_v63 = vld [vmem:[%s4502_s19 + $0x98] sm:$0xff] }
  0x23   : > { %3961 = vmatprep.subr.mxu0 %v4317_v9  ;;  %v789_v31 = vrot.slane %v775_v1, %v4331_v11  ;;  %v1059_v43 = vmul.f32 %v944_v14, %v4524_v13  ;;  %v956_v16 = vrot.slane %v4425_v46, %v4372_v24  ;;  %v1047_v39 = vmul.f32 %v896_v36, %v4538_v40 }
  0x24   : > { %3962 = vmatpush3.msra.mxu0 %v4317_v9  ;;  %3956 = vmatprep.mubr.msk.f32.mxu0 %vm791_vm0, %v741_v10  ;;  %v1080_v9 = vld [vmem:[%s5470_s4 + $0x18] sm:$0xff]  ;;  %v904_v51 = vrot.slane %v4353_v17, %v4372_v24  ;;  %v964_v59 = vrot.slane %v4431_v48, %v4372_v24  ;;  %v1048_v60 = vmul.f32 %v900_v15, %v4569_v50  ;;  %v4604_v48 = vld [vmem:[%s4502_s19 + $0x28] sm:$0xff] }
  0x25   : > { %3963 = vmatprep.subr.mxu0 %v4336_v12  ;;  %v790_v37 = vcombine.low %v782_v19, %v789_v31  ;;  %3988 = vmatprep.mubr.msk.f32.mxu1 %vm791_vm0, %v1059_v43  ;;  %v1062_v17 = vmul.f32 %v956_v16, %v4561_v49  ;;  %v968_v0 = vrot.slane %v4437_v52, %v4372_v24  ;;  %v4612_v19 = vld [vmem:[%s4502_s19 + $0xa0] sm:$0xff]  ;;  %v4615_v52 = vld [vmem:[%s4502_s19 + $0x30] sm:$0xff] }
  0x26   : > { %3964 = vmatpush3.msra.mxu0 %v4336_v12  ;;  %v952_v12 = vrot.slane %v4418_v42, %v4372_v24  ;;  %v1060_v42 = vmul.f32 %v948_v38, %v4541_v41  ;;  %v1049_v1 = vmul.f32 %v904_v51, %v4575_v55  ;;  %v912_v10 = vrot.slane %v4362_v20, %v4372_v24  ;;  %v1077_v20 = vld [vmem:[%s5470_s4] sm:$0xff]  ;;  %v4643_v38 = vld [vmem:[%s4502_s19 + $0xb0] sm:$0xff]  ;;  %v4660_v51 = vld [vmem:[%s4502_s19 + $0xb8] sm:$0xff] }
  0x27   : > { %3957 = vmatmul.mubr.msk.f32.gmra.mxu0 %vm791_vm0, %v790_v37  ;;  %3965 = vmatprep.subr.mxu0 %v4377_v25  ;;  %v916_v31 = vrot.slane %v4365_v21, %v4372_v24  ;;  %v972_v36 = vrot.slane %v4440_v53, %v4372_v24  ;;  %v4630_v37 = vld [vmem:[%s4502_s19 + $0x38] sm:$0xff]  ;;  %v1065_v21 = vmul.f32 %v968_v0, %v4612_v19 }
  0x28   : > { %3966 = vmatpush3.msra.mxu0 %v4377_v25  ;;  %3967 = vmatprep.mubr.msk.f32.mxu0 %vm791_vm0, %v1045_v5  ;;  %v1061_v46 = vmul.f32 %v952_v12, %v4553_v44  ;;  %v960_v25 = vrot.slane %v4428_v47, %v4372_v24  ;;  %v908_v47 = vrot.slane %v4356_v18, %v4372_v24  ;;  %v1078_v18 = vld [vmem:[%s5470_s4 + $0x8] sm:$0xff] }
  0x29   : > { %4015 = vmatprep.subr.mxu0 %v1080_v9  ;;  %3989 = vmatmul.mubr.msk.f32.vlgmr.msra.gmra.mxu1 %vm791_vm0, %v1060_v42  ;;  %v1064_v5 = vmul.f32 %v964_v59, %v4597_v63  ;;  %v976_v15 = vrot.slane %v4443_v54, %v4372_v24  ;;  %v1051_v43 = vmul.f32 %v912_v10, %v4615_v52  ;;  %v4698_v10 = vld [vmem:[%s4502_s19 + $0xd0] sm:$0xff] }
  0x2a   : > { %3991 = vmatprep.mubr.msk.f32.mxu1 %vm791_vm0, %v1061_v46  ;;  %v1063_v22 = vmul.f32 %v960_v25, %v4587_v57  ;;  %v1050_v14 = vmul.f32 %v908_v47, %v4604_v48  ;;  %v920_v53 = vrot.slane %v4384_v28, %v4372_v24  ;;  %v1052_v54 = vmul.f32 %v916_v31, %v4630_v37  ;;  %v4672_v25 = vld [vmem:[%s4502_s19 + $0xc0] sm:$0xff]  ;;  %v4688_v47 = vld [vmem:[%s4502_s19 + $0xc8] sm:$0xff] }
  0x2b   : > { %3968 = vmatmul.mubr.msk.f32.vlgmr.msra.gmra.mxu0 %vm791_vm0, %v1046_v45  ;;  %v4646_v45 = vld [vmem:[%s4502_s19 + $0x40] sm:$0xff]  ;;  %v980_v28 = vrot.slane %v4450_v58, %v4372_v24  ;;  %v924_v16 = vrot.slane %v4387_v29, %v4372_v24  ;;  %v984_v42 = vrot.slane %v4457_v61, %v4372_v24  ;;  %v4667_v58 = vld [vmem:[%s4502_s19 + $0x48] sm:$0xff]  ;;  %v928_v29 = vrot.slane %v4390_v30, %v4372_v24 }
  0x2c   : > { %4016 = vmatpush3.msra.mxu0 %v1080_v9  ;;  %3970 = vmatprep.mubr.msk.f32.mxu0 %vm791_vm0, %v1047_v39  ;;  %v4634_v9 = vld [vmem:[%s4502_s19 + $0xa8] sm:$0xff]  ;;  %v1067_v39 = vmul.f32 %v976_v15, %v4643_v38  ;;  %v1053_v46 = vmul.f32 %v920_v53, %v4646_v45  ;;  %v988_v59 = vrot.slane %v4460_v62, %v4372_v24 }
  0x2d   : > { %4017 = vmatprep.subr.mxu0 %v1079_v56  ;;  %3992 = vmatmul.mubr.msk.f32.gmra.mxu1 %vm791_vm0, %v1062_v17  ;;  %v1066_v12 = vmul.f32 %v972_v36, %v4634_v9  ;;  %v932_v17 = vrot.slane %v4395_v33, %v4372_v24  ;;  %v1068_v61 = vmul.f32 %v980_v28, %v4660_v51 }
  0x2e   : > { %4018 = vmatpush3.msra.mxu0 %v1079_v56  ;;  %3994 = vmatprep.mubr.msk.f32.mxu1 %vm791_vm0, %v1063_v22  ;;  %v4675_v56 = vld [vmem:[%s4502_s19 + $0x50] sm:$0xff]  ;;  %v1054_v30 = vmul.f32 %v924_v16, %v4667_v58  ;;  %v992_v33 = vrot.slane %v4467_v4, %v4372_v24  ;;  %v936_v62 = vrot.slane %v4398_v34, %v4372_v24 }
  0x2f   : > { %3971 = vmatmul.mubr.msk.f32.gmra.mxu0 %vm791_vm0, %v1048_v60  ;;  %4019 = vmatprep.subr.mxu0 %v1078_v18  ;;  %v1069_v60 = vmul.f32 %v984_v42, %v4672_v25  ;;  %v1055_v0 = vmul.f32 %v928_v29, %v4675_v56  ;;  %v940_v22 = vrot.slane %v4401_v35, %v4372_v24 }
  0x30   : > { %3973 = vmatprep.mubr.msk.f32.mxu0 %vm791_vm0, %v1049_v1  ;;  %4020 = vmatpush3.msra.mxu0 %v1078_v18  ;;  %v531_v1 = vld [vmem:[%s4502_s19 + $0x58] sm:$0xff]  ;;  %v532_v18 = vld [vmem:[%s4502_s19 + $0x60] sm:$0xff]  ;;  %v1070_v4 = vmul.f32 %v988_v59, %v4688_v47  ;;  %v996_v31 = vrot.slane %v4470_v6, %v4372_v24  ;;  %v1071_v34 = vmul.f32 %v992_v33, %v4698_v10 }
  0x31   : > { %4021 = vmatprep.subr.mxu0 %v1077_v20  ;;  %3995 = vmatmul.mubr.msk.f32.gmra.mxu1 %vm791_vm0, %v1064_v5  ;;  %v547_v5 = vld [vmem:[%s4502_s19 + $0xd8] sm:$0xff]  ;;  %v1000_v35 = vrot.slane %v4473_v8, %v4372_v24  ;;  %v1057_v36 = vmul.f32 %v936_v62, %v532_v18  ;;  %v1004_v15 = vrot.slane %v4478_v23, %v4372_v24 }
  0x32   : > { %4022 = vmatpush3.msra.mxu0 %v1077_v20  ;;  %3997 = vmatprep.mubr.msk.f32.mxu1 %vm791_vm0, %v1065_v21  ;;  %v1056_v20 = vmul.f32 %v932_v17, %v531_v1  ;;  %v548_v21 = vld [vmem:[%s4502_s19 + $0xe0] sm:$0xff]  ;;  %v1072_v6 = vmul.f32 %v996_v31, %v547_v5  ;;  %v1008_v8 = vrot.slane %v4481_v26, %v4372_v24 }
  0x33   : > { %3974 = vmatmul.mubr.msk.f32.gmra.mxu0 %vm791_vm0, %v1050_v14  ;;  %v533_v14 = vld [vmem:[%s4502_s19 + $0x68] sm:$0xff]  ;;  %v1073_v53 = vmul.f32 %v1000_v35, %v548_v21  ;;  %v1012_v16 = vrot.slane %v4484_v27, %v4372_v24  ;;  %v2220_v27 = vld [vmem:[%s5474_s8 + $0x18] sm:$0xff] }
  0x34   : > { %3976 = vmatprep.mubr.msk.f32.mxu0 %vm791_vm0, %v1051_v43  ;;  %v1058_v43 = vmul.f32 %v940_v22, %v533_v14  ;;  %4071 = vmatprep.subr.mxu1 %v2220_v27 }
  0x35   : > { %3998 = vmatmul.mubr.msk.f32.gmra.mxu1 %vm791_vm0, %v1066_v12  ;;  %v550_v12 = vld [vmem:[%s4502_s19 + $0xf0] sm:$0xff] }
  0x36   : > { %4000 = vmatprep.mubr.msk.f32.mxu1 %vm791_vm0, %v1067_v39  ;;  %v1075_v23 = vmul.f32 %v1008_v8, %v550_v12  ;;  %v551_v39 = vld [vmem:[%s4502_s19 + $0xf8] sm:$0xff]  ;;  %4072 = vmatpush3.msra.mxu1 %v2220_v27 }
  0x37   : > { %3977 = vmatmul.mubr.msk.f32.gmra.mxu0 %vm791_vm0, %v1052_v54  ;;  %v549_v54 = vld [vmem:[%s4502_s19 + $0xe8] sm:$0xff]  ;;  %v1076_v26 = vmul.f32 %v1012_v16, %v551_v39 }
  0x38   : > { %3979 = vmatprep.mubr.msk.f32.mxu0 %vm791_vm0, %v1053_v46  ;;  %v1074_v28 = vmul.f32 %v1004_v15, %v549_v54 }
  0x39   : > { %4001 = vmatmul.mubr.msk.f32.gmra.mxu1 %vm791_vm0, %v1068_v61 }
  0x3a   : > { %4003 = vmatprep.mubr.msk.f32.mxu1 %vm791_vm0, %v1069_v60 }
  0x3b   : > { %3980 = vmatmul.mubr.msk.f32.gmra.mxu0 %vm791_vm0, %v1054_v30 }
  0x3c   : > { %3982 = vmatprep.mubr.msk.f32.mxu0 %vm791_vm0, %v1055_v0 }
  0x3d   : > { %4004 = vmatmul.mubr.msk.f32.gmra.mxu1 %vm791_vm0, %v1070_v4 }
  0x3e   : > { %4006 = vmatprep.mubr.msk.f32.mxu1 %vm791_vm0, %v1071_v34  ;;  %v4843_v34 = vstv %s2119_s20 }
  0x3f   : > { %3983 = vmatmul.mubr.msk.f32.gmra.mxu0 %vm791_vm0, %v1056_v20 }
  0x40   : > { %3985 = vmatprep.mubr.msk.f32.mxu0 %vm791_vm0, %v1057_v36 }
  0x41   : > { %4007 = vmatmul.mubr.msk.f32.gmra.mxu1 %vm791_vm0, %v1072_v6 }
  0x42   : > { %4009 = vmatprep.mubr.msk.f32.mxu1 %vm791_vm0, %v1073_v53 }
  0x43   : > { %3986 = vmatmul.mubr.msk.f32.gmra.mxu0 %vm791_vm0, %v1058_v43 }
  0x44   : > { %4023 = vmatprep.mubr.msk.f32.mxu0 %vm791_vm0, %v4515_v3  ;;  %v2219_v3 = vld [vmem:[%s5474_s8 + $0x10] sm:$0xff] }
  0x45   : > { %4010 = vmatmul.mubr.msk.f32.gmra.mxu1 %vm791_vm0, %v1074_v28  ;;  %4073 = vmatprep.subr.mxu1 %v2219_v3 }
  0x46   : > { %4012 = vmatprep.mubr.msk.f32.mxu1 %vm791_vm0, %v1075_v23  ;;  %4074 = vmatpush3.msra.mxu1 %v2219_v3 }
  0x47   : > { %4024 = vmatmul.mubr.msk.f32.vlgmr.msra.gmra.mxu0 %vm791_vm0, %v4527_v32  ;;  %v2217_v32 = vld [vmem:[%s5474_s8] sm:$0xff] }
  0x48   : > { %4026 = vmatprep.mubr.msk.f32.mxu0 %vm791_vm0, %v4538_v40 }
  0x49   : > { %4013 = vmatmul.mubr.msk.f32.gmra.mxu1 %vm791_vm0, %v1076_v26 }
  0x4b   : > { %4027 = vmatmul.mubr.msk.f32.gmra.mxu0 %vm791_vm0, %v4569_v50 }
  0x4c   : > { %4029 = vmatprep.mubr.msk.f32.mxu0 %vm791_vm0, %v4575_v55 }
  0x4f   : > { %4030 = vmatmul.mubr.msk.f32.gmra.mxu0 %vm791_vm0, %v4604_v48 }
  0x50   : > { %4032 = vmatprep.mubr.msk.f32.mxu0 %vm791_vm0, %v4615_v52  ;;  %v4812_v52 = vld [vmem:[%s5472_s6] ss:$0 sm:$0xff] }
  0x53   : > { %4033 = vmatmul.mubr.msk.f32.gmra.mxu0 %vm791_vm0, %v4630_v37 }
  0x54   : > { %4035 = vmatprep.mubr.msk.f32.mxu0 %vm791_vm0, %v4646_v45 }
  0x57   : > { %4036 = vmatmul.mubr.msk.f32.gmra.mxu0 %vm791_vm0, %v4667_v58 }
  0x58   : > { %4038 = vmatprep.mubr.msk.f32.mxu0 %vm791_vm0, %v4675_v56 }
  0x5b   : > { %4039 = vmatmul.mubr.msk.f32.gmra.mxu0 %vm791_vm0, %v531_v1 }
  0x5c   : > { %4041 = vmatprep.mubr.msk.f32.mxu0 %vm791_vm0, %v532_v18 }
  0x5f   : > { %4042 = vmatmul.mubr.msk.f32.gmra.mxu0 %vm791_vm0, %v533_v14 }
  0x60   : > { %4044 = vmatprep.mubr.msk.f32.mxu0 %vm791_vm0, %v4524_v13  ;;  %v2218_v13 = vld [vmem:[%s5474_s8 + $0x8] sm:$0xff] }
  0x61   : > { %4075 = vmatprep.subr.mxu1 %v2218_v13 }
  0x62   : > { %4076 = vmatpush3.msra.mxu1 %v2218_v13 }
  0x63   : > { %4045 = vmatmul.mubr.msk.f32.gmra.mxu0 %vm791_vm0, %v4541_v41  ;;  %4077 = vmatprep.subr.mxu1 %v2217_v32 }
  0x64   : > { %4047 = vmatprep.mubr.msk.f32.mxu0 %vm791_vm0, %v4553_v44  ;;  %4078 = vmatpush3.msra.mxu1 %v2217_v32 }
  0x67   : > { %4048 = vmatmul.mubr.msk.f32.gmra.mxu0 %vm791_vm0, %v4561_v49 }
  0x68   : > { %4050 = vmatprep.mubr.msk.f32.mxu0 %vm791_vm0, %v4587_v57 }
  0x6b   : > { %4051 = vmatmul.mubr.msk.f32.gmra.mxu0 %vm791_vm0, %v4597_v63 }
  0x6c   : > { %4053 = vmatprep.mubr.msk.f32.mxu0 %vm791_vm0, %v4612_v19 }
  0x6f   : > { %4054 = vmatmul.mubr.msk.f32.gmra.mxu0 %vm791_vm0, %v4634_v9 }
  0x70   : > { %4056 = vmatprep.mubr.msk.f32.mxu0 %vm791_vm0, %v4643_v38 }
  0x73   : > { %4057 = vmatmul.mubr.msk.f32.gmra.mxu0 %vm791_vm0, %v4660_v51 }
  0x74   : > { %4059 = vmatprep.mubr.msk.f32.mxu0 %vm791_vm0, %v4672_v25 }
  0x77   : > { %4060 = vmatmul.mubr.msk.f32.gmra.mxu0 %vm791_vm0, %v4688_v47 }
  0x78   : > { %4062 = vmatprep.mubr.msk.f32.mxu0 %vm791_vm0, %v4698_v10 }
  0x7b   : > { %4063 = vmatmul.mubr.msk.f32.gmra.mxu0 %vm791_vm0, %v547_v5 }
  0x7c   : > { %4065 = vmatprep.mubr.msk.f32.mxu0 %vm791_vm0, %v548_v21 }
  0x7f   : > { %4066 = vmatmul.mubr.msk.f32.gmra.mxu0 %vm791_vm0, %v549_v54 }
  0x80   : > { %4068 = vmatprep.mubr.msk.f32.mxu0 %vm791_vm0, %v550_v12 }
  0x83   : > { %4069 = vmatmul.mubr.msk.f32.gmra.mxu0 %vm791_vm0, %v551_v39 }
  0xe1   : > { %v3955_v40 = vpop.f32.mrf.mxu0 }
  0xe2   : > { %v872_v33 = vadd.f32 %v3955_v40, %v4812_v52 }
  0xe3   : > { %v866_v41 = vpop.f32.mrf.mxu0 }
  0xe4   : > { %v867_v9 = vadd.f32 %v4812_v52, %v866_v41  ;;  %v1787_v36 = vrot.slane %v872_v33, %v4331_v11  ;;  %v1780_v54 = vcombine.high %v872_v33, %v872_v33 }
  0xe6   : > { %v1738_v51 = vrot.slane %v867_v9, %v4331_v11  ;;  %v1731_v46 = vcombine.high %v867_v9, %v867_v9  ;;  %v1795_v27 = vcombine.high %v1787_v36, %v1787_v36 }
  0xe7   : > { %v4803_v44 = vpop.f32.mrf.mxu0 }
  0xe8   : > { %v1746_v29 = vcombine.high %v1738_v51, %v1738_v51  ;;  %v1745_v17 = vrot.slane %v1731_v46, %v4331_v11  ;;  %v1754_v30 = vrot.slane %v1738_v51, %v4331_v11 }
  0xe9   : > { %v4805_v49 = vpop.f32.mrf.mxu0  ;;  %v4828_v56 = vpop.f32.mrf.mxu1 }
  0xea   : > { %v1768_v59 = vrot.slane %v1746_v29, %v4331_v11  ;;  %v1747_v0 = vcombine.high %v1745_v17, %v1745_v17  ;;  %v1776_v4 = vcombine.high %v1754_v30, %v1754_v30  ;;  %v1930_v35 = vrot.slane %v1754_v30, %v4372_v24 }
  0xeb   : > { %v3969_v50 = vpop.f32.mrf.mxu0  ;;  %v4837_v47 = vpop.f32.mrf.mxu1  ;;  %v1761_v6 = vrot.slane %v1745_v17, %v4331_v11  ;;  %v1803_v30 = vrot.slane %v1787_v36, %v4331_v11 }
  0xec   : > { %v1934_v10 = vrot.slane %v1768_v59, %v4372_v24  ;;  %v1778_v18 = vcombine.high %v1768_v59, %v1768_v59  ;;  %v1775_v21 = vrot.slane %v1747_v0, %v4331_v11  ;;  %v1938_v28 = vrot.slane %v1776_v4, %v4372_v24 }
  0xed   : > { %v1247_v55 = vpop.f32.mrf.mxu0  ;;  %v4841_v31 = vpop.f32.mrf.mxu1  ;;  %v1946_v32 = vrot.slane %v1761_v6, %v4372_v24  ;;  %v1777_v46 = vcombine.high %v1761_v6, %v1761_v6  ;;  %v1817_v0 = vrot.slane %v1795_v27, %v4331_v11 }
  0xee   : > { %v1942_v53 = vrot.slane %v1778_v18, %v4372_v24  ;;  %v1950_v13 = vrot.slane %v1775_v21, %v4372_v24 }
  0xef   : > { %v3972_v57 = vpop.f32.mrf.mxu0  ;;  %v4852_v16 = vpop.f32.mrf.mxu1 }
  0xf1   : > { %v1257_v63 = vpop.f32.mrf.mxu0 }
  0xf3   : > { %v3975_v48 = vpop.f32.mrf.mxu0 }
  0xf5   : > { %v4807_v19 = vpop.f32.mrf.mxu0 }
  0xf7   : > { %v4814_v37 = vpop.f32.mrf.mxu0 }
  0xf9   : > { %v4817_v38 = vpop.f32.mrf.mxu0 }
  0xfb   : > { %v4819_v45 = vpop.f32.mrf.mxu0 }
  0xfd   : > { %v4822_v42 = vpop.f32.mrf.mxu0 }
  0xff   : > { %v4824_v58 = vpop.f32.mrf.mxu0 }
 0x101   : > { %v4826_v25 = vpop.f32.mrf.mxu0 }
 0x103   : > { %v4831_v61 = vpop.f32.mrf.mxu0 }
 0x105   : > { %v4835_v60 = vpop.f32.mrf.mxu0 }
 0x107   : > { %v4025_v1 = vpop.f32.mrf.mxu0 }
 0x108   : > { %v1574_v62 = vadd.f32 %v4025_v1, %v3969_v50 }
 0x109   : > { %v1568_v22 = vpop.f32.mrf.mxu0 }
 0x10a   : > { %v2088_v20 = vadd.f32 %v1934_v10, %v1574_v62  ;;  %v1569_v5 = vadd.f32 %v1568_v22, %v1247_v55  ;;  %v1779_v55 = vcombine.high %v1775_v21, %v1775_v21  ;;  %v877_v21 = vadd.f32 %v4812_v52, %v4805_v49 }
 0x10b   : > { %v4028_v14 = vpop.f32.mrf.mxu0 }
 0x10c   : > { %v2087_v15 = vadd.f32 %v1930_v35, %v1569_v5  ;;  %v1584_v43 = vadd.f32 %v4028_v14, %v3972_v57  ;;  %v2154_v8 = vmul.f32 %v4843_v34, %v2088_v20  ;;  %vm2121_vm1 = vcmp.ge.f32.partialorder %v2088_v20, 0.0 }
 0x10d   : > { %v1578_v12 = vpop.f32.mrf.mxu0  ;;  %v1958_v10 = vrot.slane %v1779_v55, %v4372_v24 }
 0x10e   : > { %v2153_v23 = vmul.f32 %v4843_v34, %v2087_v15  ;;  %v2090_v39 = vadd.f32 %v1942_v53, %v1584_v43  ;;  %v1579_v26 = vadd.f32 %v1578_v12, %v1257_v63  ;;  %vm2120_vm2 = vcmp.ge.f32.partialorder %v2087_v15, 0.0  ;;  %v4859_v63 = vpop.f32.mrf.mxu1 }
 0x10f   : > { %v4031_v3 = vpop.f32.mrf.mxu0  ;;  %v2186_v57 = vsel %vm2121_vm1, %v2088_v20, %v2154_v8  ;;  %v1962_v43 = vrot.slane %v1803_v30, %v4372_v24  ;;  %v1827_v12 = vcombine.high %v1817_v0, %v1817_v0 }
 0x110   : > { %v2089_v40 = vadd.f32 %v1938_v28, %v1579_v26  ;;  %v1594_v41 = vadd.f32 %v4031_v3, %v3975_v48  ;;  %v2185_v50 = vsel %vm2120_vm2, %v2087_v15, %v2153_v23  ;;  %v2156_v9 = vmul.f32 %v4843_v34, %v2090_v39  ;;  %v4873_v5 = vpop.f32.mrf.mxu1 }
 0x111   : > { %v1588_v51 = vpop.f32.mrf.mxu0  ;;  %4079 = vmatprep.mubr.msk.f32.mxu1 %vm791_vm0, %v2185_v50  ;;  %vm2123_vm3 = vcmp.ge.f32.partialorder %v2090_v39, 0.0  ;;  %v1794_v48 = vrot.slane %v1780_v54, %v4331_v11  ;;  %v1966_v15 = vrot.slane %v1817_v0, %v4372_v24  ;;  %v1974_v55 = vrot.slane %v1827_v12, %v4372_v24 }
 0x112   : > { %v2155_v29 = vmul.f32 %v4843_v34, %v2089_v40  ;;  %v2092_v17 = vadd.f32 %v1950_v13, %v1594_v41  ;;  %v1589_v59 = vadd.f32 %v1588_v51, %v4807_v19  ;;  %4080 = vmatmul.mubr.msk.f32.vlgmr.msra.gmra.mxu1 %vm791_vm0, %v2186_v57  ;;  %vm2122_vm4 = vcmp.ge.f32.partialorder %v2089_v40, 0.0  ;;  %v4886_v49 = vpop.f32.mrf.mxu1 }
 0x113   : > { %v4034_v33 = vpop.f32.mrf.mxu0  ;;  %v1954_v19 = vrot.slane %v1777_v46, %v4372_v24  ;;  %v2188_v20 = vsel %vm2123_vm3, %v2090_v39, %v2156_v9  ;;  %v1796_v14 = vcombine.high %v1794_v48, %v1794_v48  ;;  %v1825_v39 = vcombine.high %v1803_v30, %v1803_v30 }
 0x114   : > { %v2091_v1 = vadd.f32 %v1946_v32, %v1589_v59  ;;  %v1604_v62 = vadd.f32 %v4034_v33, %v4814_v37  ;;  %v2187_v18 = vsel %vm2122_vm4, %v2089_v40, %v2155_v29  ;;  %v2158_v22 = vmul.f32 %v4843_v34, %v2092_v17  ;;  %v4900_v29 = vpop.f32.mrf.mxu1 }
 0x115   : > { %v1598_v4 = vpop.f32.mrf.mxu0  ;;  %4082 = vmatprep.mubr.msk.f32.mxu1 %vm791_vm0, %v2187_v18  ;;  %vm2125_vm5 = vcmp.ge.f32.partialorder %v2092_v17, 0.0  ;;  %v1824_v32 = vrot.slane %v1796_v14, %v4331_v11  ;;  %v1810_v40 = vrot.slane %v1794_v48, %v4331_v11  ;;  %v1829_v48 = vcombine.high %v877_v21, %v877_v21 }
 0x116   : > { %v2157_v35 = vmul.f32 %v4843_v34, %v2091_v1  ;;  %v2094_v36 = vadd.f32 %v1958_v10, %v1604_v62  ;;  %v1599_v37 = vadd.f32 %v1598_v4, %v4817_v38  ;;  %4083 = vmatmul.mubr.msk.f32.gmra.mxu1 %vm791_vm0, %v2188_v20  ;;  %vm2124_vm6 = vcmp.ge.f32.partialorder %v2091_v1, 0.0 }
 0x117   : > { %v4037_v6 = vpop.f32.mrf.mxu0  ;;  %v2190_v23 = vsel %vm2125_vm5, %v2092_v17, %v2158_v22  ;;  %v1982_v0 = vrot.slane %v1824_v32, %v4372_v24  ;;  %v1978_v18 = vrot.slane %v1810_v40, %v4372_v24  ;;  %v1826_v20 = vcombine.high %v1810_v40, %v1810_v40 }
 0x118   : > { %v2093_v53 = vadd.f32 %v1954_v19, %v1599_v37  ;;  %v1614_v54 = vadd.f32 %v4037_v6, %v4819_v45  ;;  %v2189_v8 = vsel %vm2124_vm6, %v2091_v1, %v2157_v35  ;;  %v2160_v28 = vmul.f32 %v4843_v34, %v2094_v36  ;;  %v4911_v35 = vpop.f32.mrf.mxu1 }
 0x119   : > { %v1608_v38 = vpop.f32.mrf.mxu0  ;;  %4085 = vmatprep.mubr.msk.f32.mxu1 %vm791_vm0, %v2189_v8  ;;  %vm2127_vm7 = vcmp.ge.f32.partialorder %v2094_v36, 0.0  ;;  %v1836_v45 = vrot.slane %v877_v21, %v4331_v11  ;;  %v1828_v1 = vcombine.high %v1824_v32, %v1824_v32 }
 0x11a   : > { %v2159_v26 = vmul.f32 %v4843_v34, %v2093_v53  ;;  %v2096_v27 = vadd.f32 %v1966_v15, %v1614_v54  ;;  %v1609_v3 = vadd.f32 %v1608_v38, %v4822_v42  ;;  %4086 = vmatmul.mubr.msk.f32.gmra.mxu1 %vm791_vm0, %v2190_v23  ;;  %vm2126_vm8 = vcmp.ge.f32.partialorder %v2093_v53, 0.0  ;;  %v4925_v23 = vpop.f32.mrf.mxu1 }
 0x11b   : > { %v4040_v13 = vpop.f32.mrf.mxu0  ;;  %v1970_v42 = vrot.slane %v1825_v39, %v4372_v24  ;;  %v2192_v46 = vsel %vm2127_vm7, %v2094_v36, %v2160_v28  ;;  %v1844_v30 = vcombine.high %v1836_v45, %v1836_v45  ;;  %v1852_v21 = vrot.slane %v1836_v45, %v4331_v11 }
 0x11c   : > { %v2095_v41 = vadd.f32 %v1962_v43, %v1609_v3  ;;  %v1624_v50 = vadd.f32 %v4040_v13, %v4824_v58  ;;  %v2191_v57 = vsel %vm2126_vm8, %v2093_v53, %v2159_v26  ;;  %v2162_v9 = vmul.f32 %v4843_v34, %v2096_v27 }
 0x11d   : > { %v1618_v51 = vpop.f32.mrf.mxu0  ;;  %4088 = vmatprep.mubr.msk.f32.mxu1 %vm791_vm0, %v2191_v57  ;;  %vm2129_vm9 = vcmp.ge.f32.partialorder %v2096_v27, 0.0  ;;  %v1866_v15 = vrot.slane %v1844_v30, %v4331_v11  ;;  %v1990_v54 = vrot.slane %v1828_v1, %v4372_v24  ;;  %v1994_v32 = vrot.slane %v1852_v21, %v4372_v24 }
 0x11e   : > { %v2161_v17 = vmul.f32 %v4843_v34, %v2095_v41  ;;  %v2098_v59 = vadd.f32 %v1974_v55, %v1624_v50  ;;  %v1619_v58 = vadd.f32 %v1618_v51, %v4826_v25  ;;  %4089 = vmatmul.mubr.msk.f32.gmra.mxu1 %vm791_vm0, %v2192_v46  ;;  %vm2128_vm10 = vcmp.ge.f32.partialorder %v2095_v41, 0.0 }
 0x11f   : > { %v4043_v33 = vpop.f32.mrf.mxu0  ;;  %v2194_v25 = vsel %vm2129_vm9, %v2096_v27, %v2162_v9  ;;  %v4932_v27 = vadd.f32 %v4803_v44, %v4812_v52  ;;  %v1998_v13 = vrot.slane %v1866_v15, %v4372_v24  ;;  %v1876_v55 = vcombine.high %v1866_v15, %v1866_v15  ;;  %v4940_v52 = vpop.f32.mrf.mxu1 }
 0x120   : > { %v2097_v62 = vadd.f32 %v1970_v42, %v1619_v58  ;;  %v1634_v10 = vadd.f32 %v4043_v33, %v4831_v61  ;;  %v2193_v22 = vsel %vm2128_vm10, %v2095_v41, %v2161_v17  ;;  %v2164_v4 = vmul.f32 %v4843_v34, %v2098_v59 }
 0x121   : > { %v1628_v19 = vpop.f32.mrf.mxu0  ;;  %4091 = vmatprep.mubr.msk.f32.mxu1 %vm791_vm0, %v2193_v22  ;;  %vm2131_vm11 = vcmp.ge.f32.partialorder %v2098_v59, 0.0  ;;  %v1843_v61 = vrot.slane %v1829_v48, %v4331_v11  ;;  %v1874_v44 = vcombine.high %v1852_v21, %v1852_v21  ;;  %v2006_v33 = vrot.slane %v1876_v55, %v4372_v24 }
 0x122   : > { %v2163_v36 = vmul.f32 %v4843_v34, %v2097_v62  ;;  %v2100_v37 = vadd.f32 %v1982_v0, %v1634_v10  ;;  %v1629_v14 = vadd.f32 %v1628_v19, %v4835_v60  ;;  %4092 = vmatmul.mubr.msk.f32.gmra.mxu1 %vm791_vm0, %v2194_v25  ;;  %vm2130_vm12 = vcmp.ge.f32.partialorder %v2097_v62, 0.0 }
 0x123   : > { %v4046_v6 = vpop.f32.mrf.mxu0  ;;  %v1986_v60 = vrot.slane %v1826_v20, %v4372_v24  ;;  %v2196_v38 = vsel %vm2131_vm11, %v2098_v59, %v2164_v4  ;;  %v1845_v3 = vcombine.high %v1843_v61, %v1843_v61  ;;  %v1859_v58 = vrot.slane %v1843_v61, %v4331_v11 }
 0x124   : > { %v2099_v43 = vadd.f32 %v1978_v18, %v1629_v14  ;;  %v1644_v53 = vadd.f32 %v4046_v6, %v4828_v56  ;;  %v2195_v8 = vsel %vm2130_vm12, %v2097_v62, %v2163_v36  ;;  %v2166_v12 = vmul.f32 %v4843_v34, %v2100_v37  ;;  %v4955_v18 = vpop.f32.mrf.mxu1 }
 0x125   : > { %v1638_v28 = vpop.f32.mrf.mxu0  ;;  %4094 = vmatprep.mubr.msk.f32.mxu1 %vm791_vm0, %v2195_v8  ;;  %vm2133_vm13 = vcmp.ge.f32.partialorder %v2100_v37, 0.0  ;;  %v1873_v59 = vrot.slane %v1845_v3, %v4331_v11  ;;  %v2002_v62 = vrot.slane %v1874_v44, %v4372_v24  ;;  %v1878_v19 = vcombine.high %v4932_v27, %v4932_v27 }
 0x126   : > { %v2165_v39 = vmul.f32 %v4843_v34, %v2099_v43  ;;  %v2102_v26 = vadd.f32 %v1990_v54, %v1644_v53  ;;  %v1639_v56 = vadd.f32 %v1638_v28, %v4837_v47  ;;  %4095 = vmatmul.mubr.msk.f32.gmra.mxu1 %vm791_vm0, %v2196_v38  ;;  %vm2132_vm14 = vcmp.ge.f32.partialorder %v2099_v43, 0.0  ;;  %v4008_v54 = vpop.f32.mrf.mxu1 }
 0x127   : > { %v4049_v45 = vpop.f32.mrf.mxu0  ;;  %v2198_v9 = vsel %vm2133_vm13, %v2100_v37, %v2166_v12  ;;  %v2014_v36 = vrot.slane %v1873_v59, %v4372_v24  ;;  %v2010_v37 = vrot.slane %v1859_v58, %v4372_v24  ;;  %v1877_v6 = vcombine.high %v1873_v59, %v1873_v59 }
 0x128   : > { %v2101_v40 = vadd.f32 %v1986_v60, %v1639_v56  ;;  %v1654_v41 = vadd.f32 %v4049_v45, %v4841_v31  ;;  %v2197_v50 = vsel %vm2132_vm14, %v2099_v43, %v2165_v39  ;;  %v2168_v47 = vmul.f32 %v4843_v34, %v2102_v26 }
 0x129   : > { %v1648_v57 = vpop.f32.mrf.mxu0  ;;  %4097 = vmatprep.mubr.msk.f32.mxu1 %vm791_vm0, %v2197_v50  ;;  %vm2135_vm15 = vcmp.ge.f32.partialorder %v2102_v26, 0.0  ;;  %v1885_v31 = vrot.slane %v4932_v27, %v4331_v11  ;;  %v1875_v53 = vcombine.high %v1859_v58, %v1859_v58  ;;  %v2022_v27 = vrot.slane %v1877_v6, %v4372_v24 }
 0x12a   : > { %v2167_v51 = vmul.f32 %v4843_v34, %v2101_v40  ;;  %v2104_v42 = vadd.f32 %v1998_v13, %v1654_v41  ;;  %v1649_v46 = vadd.f32 %v1648_v57, %v4852_v16  ;;  %4098 = vmatmul.mubr.msk.f32.gmra.mxu1 %vm791_vm0, %v2198_v9  ;;  %vm2134_vm1 = vcmp.ge.f32.partialorder %v2101_v40, 0.0 }
 0x12b   : > { %v4052_v17 = vpop.f32.mrf.mxu0  ;;  %v2200_v10 = vsel %vm2135_vm15, %v2102_v26, %v2168_v47  ;;  %v1893_v25 = vcombine.high %v1885_v31, %v1885_v31  ;;  %v1901_v60 = vrot.slane %v1885_v31, %v4331_v11 }
 0x12c   : > { %v2103_v48 = vadd.f32 %v1994_v32, %v1649_v46  ;;  %v1664_v30 = vadd.f32 %v4052_v17, %v4859_v63  ;;  %v2199_v0 = vsel %vm2134_vm1, %v2101_v40, %v2167_v51  ;;  %v2170_v1 = vmul.f32 %v4843_v34, %v2104_v42  ;;  %v1377_v40 = vpop.f32.mrf.mxu1 }
 0x12d   : > { %v1658_v16 = vpop.f32.mrf.mxu0  ;;  %4100 = vmatprep.mubr.msk.f32.mxu1 %vm791_vm0, %v2199_v0  ;;  %vm2137_vm2 = vcmp.ge.f32.partialorder %v2104_v42, 0.0  ;;  %v1915_v39 = vrot.slane %v1893_v25, %v4331_v11  ;;  %v2026_v9 = vrot.slane %v1901_v60, %v4372_v24  ;;  %v1923_v58 = vcombine.high %v1901_v60, %v1901_v60 }
 0x12e   : > { %v2169_v22 = vmul.f32 %v4843_v34, %v2103_v48  ;;  %v2106_v4 = vadd.f32 %v2006_v33, %v1664_v30  ;;  %v1659_v63 = vadd.f32 %v1658_v16, %v4873_v5  ;;  %4101 = vmatmul.mubr.msk.f32.gmra.mxu1 %vm791_vm0, %v2200_v10  ;;  %vm2136_vm3 = vcmp.ge.f32.partialorder %v2103_v48, 0.0  ;;  %v4011_v59 = vpop.f32.mrf.mxu1 }
 0x12f   : > { %v4055_v20 = vpop.f32.mrf.mxu0  ;;  %v2202_v43 = vsel %vm2137_vm2, %v2104_v42, %v2170_v1  ;;  %v2030_v57 = vrot.slane %v1915_v39, %v4372_v24  ;;  %v1925_v46 = vcombine.high %v1915_v39, %v1915_v39 }
 0x130   : > { %v2105_v14 = vadd.f32 %v2002_v62, %v1659_v63  ;;  %v1674_v61 = vadd.f32 %v4055_v20, %v4886_v49  ;;  %v2201_v21 = vsel %vm2136_vm3, %v2103_v48, %v2169_v22  ;;  %v2172_v15 = vmul.f32 %v4843_v34, %v2106_v4  ;;  %v1387_v25 = vpop.f32.mrf.mxu1 }
 0x131   : > { %v1668_v5 = vpop.f32.mrf.mxu0  ;;  %4103 = vmatprep.mubr.msk.f32.mxu1 %vm791_vm0, %v2201_v21  ;;  %vm2139_vm4 = vcmp.ge.f32.partialorder %v2106_v4, 0.0  ;;  %v1892_v49 = vrot.slane %v1878_v19, %v4331_v11  ;;  %v2038_v10 = vrot.slane %v1925_v46, %v4372_v24  ;;  %v2034_v19 = vrot.slane %v1923_v58, %v4372_v24  ;;  %v5024_v46 = vld [vmem:[%s5475_s9] ss:$0 sm:$0xff] }
 0x132   : > { %v2171_v8 = vmul.f32 %v4843_v34, %v2105_v14  ;;  %v2108_v12 = vadd.f32 %v2014_v36, %v1674_v61  ;;  %v1669_v28 = vadd.f32 %v1668_v5, %v4900_v29  ;;  %4104 = vmatmul.mubr.msk.f32.gmra.mxu1 %vm791_vm0, %v2202_v43  ;;  %vm2138_vm5 = vcmp.ge.f32.partialorder %v2105_v14, 0.0 }
 0x133   : > { %v4058_v38 = vpop.f32.mrf.mxu0  ;;  %v2018_v29 = vrot.slane %v1875_v53, %v4372_v24  ;;  %v2204_v32 = vsel %vm2139_vm4, %v2106_v4, %v2172_v15  ;;  %v1908_v1 = vrot.slane %v1892_v49, %v4331_v11  ;;  %v4014_v53 = vpop.f32.mrf.mxu1  ;;  %vm2686_vm4 = vcmask 130048  }
 0x134   : > { %v2107_v26 = vadd.f32 %v2010_v37, %v1669_v28  ;;  %v1684_v56 = vadd.f32 %v4058_v38, %v4911_v35  ;;  %v2203_v3 = vsel %vm2138_vm5, %v2105_v14, %v2171_v8  ;;  %v2174_v45 = vmul.f32 %v4843_v34, %v2108_v12 }
 0x135   : > { %v1678_v13 = vpop.f32.mrf.mxu0  ;;  %4106 = vmatprep.mubr.msk.f32.mxu1 %vm791_vm0, %v2203_v3  ;;  %vm2141_vm6 = vcmp.ge.f32.partialorder %v2108_v12, 0.0  ;;  %v1894_v35 = vcombine.high %v1892_v49, %v1892_v49  ;;  %v2042_v15 = vrot.slane %v1908_v1, %v4372_v24 }
 0x136   : > { %v2173_v41 = vmul.f32 %v4843_v34, %v2107_v26  ;;  %v2110_v50 = vadd.f32 %v2022_v27, %v1684_v56  ;;  %v1679_v55 = vadd.f32 %v1678_v13, %v4925_v23  ;;  %4107 = vmatmul.mubr.msk.f32.gmra.mxu1 %vm791_vm0, %v2204_v32  ;;  %vm2140_vm7 = vcmp.ge.f32.partialorder %v2107_v26, 0.0 }
 0x137   : > { %v4061_v47 = vpop.f32.mrf.mxu0  ;;  %v2206_v23 = vsel %vm2141_vm6, %v2108_v12, %v2174_v45  ;;  %v1922_v0 = vrot.slane %v1894_v35, %v4331_v11  ;;  %v1924_v12 = vcombine.high %v1908_v1, %v1908_v1  ;;  %v1397_v45 = vpop.f32.mrf.mxu1 }
 0x138   : > { %v2109_v44 = vadd.f32 %v2018_v29, %v1679_v55  ;;  %v1694_v51 = vadd.f32 %v4061_v47, %v4940_v52  ;;  %v2205_v42 = vsel %vm2140_vm7, %v2107_v26, %v2173_v41  ;;  %v2176_v31 = vmul.f32 %v4843_v34, %v2110_v50 }
 0x139   : > { %v1688_v17 = vpop.f32.mrf.mxu0  ;;  %4109 = vmatprep.mubr.msk.f32.mxu1 %vm791_vm0, %v2205_v42  ;;  %vm2143_vm8 = vcmp.ge.f32.partialorder %v2110_v50, 0.0  ;;  %v2046_v14 = vrot.slane %v1922_v0, %v4372_v24  ;;  %v1926_v61 = vcombine.high %v1922_v0, %v1922_v0  ;;  %v2050_v29 = vrot.slane %v1924_v12, %v4372_v24 }
 0x13a   : > { %v2175_v48 = vmul.f32 %v4843_v34, %v2109_v44  ;;  %v2112_v30 = vadd.f32 %v2030_v57, %v1694_v51  ;;  %v1689_v33 = vadd.f32 %v1688_v17, %v4955_v18  ;;  %4110 = vmatmul.mubr.msk.f32.gmra.mxu1 %vm791_vm0, %v2206_v23  ;;  %vm2142_vm9 = vcmp.ge.f32.partialorder %v2109_v44, 0.0 }
 0x13b   : > { %v4064_v52 = vpop.f32.mrf.mxu0  ;;  %v2208_v18 = vsel %vm2143_vm8, %v2110_v50, %v2176_v31  ;;  %v2054_v56 = vrot.slane %v1926_v61, %v4372_v24  ;;  %v4204_v42 = vmov 0   ;;  %v5026_v31 = vstv %s2549_s21 }
 0x13c   : > { %v2111_v16 = vadd.f32 %v2026_v9, %v1689_v33  ;;  %v1704_v62 = vadd.f32 %v4064_v52, %v4008_v54  ;;  %v2207_v22 = vsel %vm2142_vm9, %v2109_v44, %v2175_v48  ;;  %v2178_v4 = vmul.f32 %v4843_v34, %v2112_v30  ;;  %4145 = vset.pattern.permute.xlu0 %v4204_v42  ;;  %v5034_v48 = vld [vmem:[%s5477_s11] ss:$0 sm:$0xff] }
 0x13d   : > { %v1698_v63 = vpop.f32.mrf.mxu0  ;;  %4112 = vmatprep.mubr.msk.f32.mxu1 %vm791_vm0, %v2207_v22  ;;  %vm2145_vm10 = vcmp.ge.f32.partialorder %v2112_v30, 0.0  ;;  %4146 = vset.pattern.permute.xlu1 %v4204_v42 }
 0x13e   : > { %v2177_v20 = vmul.f32 %v4843_v34, %v2111_v16  ;;  %v2114_v36 = vadd.f32 %v2038_v10, %v1704_v62  ;;  %v1699_v11 = vadd.f32 %v1698_v63, %v1377_v40  ;;  %4113 = vmatmul.mubr.msk.f32.gmra.mxu1 %vm791_vm0, %v2208_v18  ;;  %vm2144_vm11 = vcmp.ge.f32.partialorder %v2111_v16, 0.0 }
 0x13f   : > { %v4067_v37 = vpop.f32.mrf.mxu0  ;;  %v2210_v8 = vsel %vm2145_vm10, %v2112_v30, %v2178_v4 }
 0x140   : > { %v2113_v21 = vadd.f32 %v2034_v19, %v1699_v11  ;;  %v1714_v6 = vadd.f32 %v4067_v37, %v4011_v59  ;;  %v2209_v5 = vsel %vm2144_vm11, %v2111_v16, %v2177_v20  ;;  %v2180_v43 = vmul.f32 %v4843_v34, %v2114_v36 }
 0x141   : > { %v1708_v54 = vpop.f32.mrf.mxu0  ;;  %4115 = vmatprep.mubr.msk.f32.mxu1 %vm791_vm0, %v2209_v5  ;;  %vm2147_vm12 = vcmp.ge.f32.partialorder %v2114_v36, 0.0 }
 0x142   : > { %v2179_v28 = vmul.f32 %v4843_v34, %v2113_v21  ;;  %v2116_v49 = vadd.f32 %v2046_v14, %v1714_v6  ;;  %v1709_v60 = vadd.f32 %v1708_v54, %v1387_v25  ;;  %4116 = vmatmul.mubr.msk.f32.gmra.mxu1 %vm791_vm0, %v2210_v8  ;;  %vm2146_vm13 = vcmp.ge.f32.partialorder %v2113_v21, 0.0 }
 0x143   : > { %v4070_v38 = vpop.f32.mrf.mxu0  ;;  %v2212_v32 = vsel %vm2147_vm12, %v2114_v36, %v2180_v43 }
 0x144   : > { %v2115_v39 = vadd.f32 %v2042_v15, %v1709_v60  ;;  %v1724_v26 = vadd.f32 %v4070_v38, %v4014_v53  ;;  %v2211_v27 = vsel %vm2146_vm13, %v2113_v21, %v2179_v28  ;;  %v2182_v3 = vmul.f32 %v4843_v34, %v2116_v49 }
 0x145   : > { %v1718_v13 = vpop.f32.mrf.mxu0  ;;  %4118 = vmatprep.mubr.msk.f32.mxu1 %vm791_vm0, %v2211_v27  ;;  %vm2149_vm14 = vcmp.ge.f32.partialorder %v2116_v49, 0.0 }
 0x146   : > { %v2181_v40 = vmul.f32 %v4843_v34, %v2115_v39  ;;  %v2118_v41 = vadd.f32 %v2054_v56, %v1724_v26  ;;  %v1719_v50 = vadd.f32 %v1718_v13, %v1397_v45  ;;  %4119 = vmatmul.mubr.msk.f32.gmra.mxu1 %vm791_vm0, %v2212_v32  ;;  %vm2148_vm15 = vcmp.ge.f32.partialorder %v2115_v39, 0.0 }
 0x147   : > { %v2214_v57 = vsel %vm2149_vm14, %v2116_v49, %v2182_v3 }
 0x148   : > { %v2117_v55 = vadd.f32 %v2050_v29, %v1719_v50  ;;  %v2213_v35 = vsel %vm2148_vm15, %v2115_v39, %v2181_v40  ;;  %v2184_v47 = vmul.f32 %v4843_v34, %v2118_v41  ;;  %vm2151_vm2 = vcmp.ge.f32.partialorder %v2118_v41, 0.0 }
 0x149   : > { %4121 = vmatprep.mubr.msk.f32.mxu1 %vm791_vm0, %v2213_v35 }
 0x14a   : > { %v2183_v9 = vmul.f32 %v4843_v34, %v2117_v55  ;;  %4122 = vmatmul.mubr.msk.f32.gmra.mxu1 %vm791_vm0, %v2214_v57  ;;  %vm2150_vm1 = vcmp.ge.f32.partialorder %v2117_v55, 0.0  ;;  %v2216_v51 = vsel %vm2151_vm2, %v2118_v41, %v2184_v47 }
 0x14c   : > { %v2215_v44 = vsel %vm2150_vm1, %v2117_v55, %v2183_v9 }
 0x14d   : > { %4124 = vmatprep.mubr.msk.f32.mxu1 %vm791_vm0, %v2215_v44 }
 0x14e   : > { %4125 = vmatmul.mubr.msk.f32.gmra.mxu1 %vm791_vm0, %v2216_v51 }
 0x1d2   : > { %v4081_v34 = vpop.f32.mrf.mxu1 }
 0x1d3   : > { %v2396_v17 = vadd.f32 %v4081_v34, %v5024_v46 }
 0x1d4   : > { %v2390_v23 = vpop.f32.mrf.mxu1 }
 0x1d5   : > { %v2584_v59 = vmul.f32 %v5026_v31, %v2396_v17  ;;  %v2391_v58 = vadd.f32 %v5024_v46, %v2390_v23  ;;  %vm2551_vm3 = vcmp.ge.f32.partialorder %v2396_v17, 0.0 }
 0x1d6   : > { %v4084_v30 = vpop.f32.mrf.mxu1 }
 0x1d7   : > { %vm2550_vm5 = vcmp.ge.f32.partialorder %v2391_v58, 0.0  ;;  %v2583_v33 = vmul.f32 %v5026_v31, %v2391_v58  ;;  %v2406_v52 = vadd.f32 %v4084_v30, %v5024_v46  ;;  %v2616_v0 = vsel %vm2551_vm3, %v2396_v17, %v2584_v59 }
 0x1d8   : > { %v2400_v1 = vpop.f32.mrf.mxu1  ;;  %v2655_v16 = vmul.f32 %v5034_v48, %v2616_v0 }
 0x1d9   : > { %v2586_v62 = vmul.f32 %v5026_v31, %v2406_v52  ;;  %v2401_v10 = vadd.f32 %v5024_v46, %v2400_v1  ;;  %v2615_v22 = vsel %vm2550_vm5, %v2391_v58, %v2583_v33  ;;  %vm2553_vm6 = vcmp.ge.f32.partialorder %v2406_v52, 0.0 }
 0x1da   : > { %v4087_v4 = vpop.f32.mrf.mxu1  ;;  %v2690_v63 = vsel %vm2686_vm4, %v2655_v16, 0.0  ;;  %v2654_v19 = vmul.f32 %v5034_v48, %v2615_v22 }
 0x1db   : > { %vm2552_vm7 = vcmp.ge.f32.partialorder %v2401_v10, 0.0  ;;  %v2585_v18 = vmul.f32 %v5026_v31, %v2401_v10  ;;  %v2416_v25 = vadd.f32 %v4087_v4, %v5024_v46  ;;  %2691 = vadd.xlane.f32.xlu0 %v2690_v63  ;;  %v2618_v20 = vsel %vm2553_vm6, %v2406_v52, %v2586_v62 }
 0x1dc   : > { %v2410_v36 = vpop.f32.mrf.mxu1  ;;  %v2657_v11 = vmul.f32 %v5034_v48, %v2618_v20  ;;  %v2687_v6 = vsel %vm2686_vm4, %v2654_v19, 0.0 }
 0x1dd   : > { %vm2555_vm8 = vcmp.ge.f32.partialorder %v2416_v25, 0.0  ;;  %v2588_v37 = vmul.f32 %v5026_v31, %v2416_v25  ;;  %v2411_v14 = vadd.f32 %v5024_v46, %v2410_v36  ;;  %v2617_v61 = vsel %vm2552_vm7, %v2401_v10, %v2585_v18 }
 0x1de   : > { %v4090_v21 = vpop.f32.mrf.mxu1  ;;  %v2696_v15 = vsel %vm2686_vm4, %v2657_v11, 0.0  ;;  %v2656_v5 = vmul.f32 %v5034_v48, %v2617_v61 }
 0x1df   : > { %vm2554_vm9 = vcmp.ge.f32.partialorder %v2411_v14, 0.0  ;;  %v2587_v43 = vmul.f32 %v5026_v31, %v2411_v14  ;;  %v2426_v53 = vadd.f32 %v4090_v21, %v5024_v46  ;;  %2688 = vadd.xlane.f32.xlu0 %v2687_v6  ;;  %2697 = vadd.xlane.f32.xlu1 %v2696_v15  ;;  %v2620_v54 = vsel %vm2555_vm8, %v2416_v25, %v2588_v37 }
 0x1e0   : > { %v2420_v8 = vpop.f32.mrf.mxu1  ;;  %v2659_v12 = vmul.f32 %v5034_v48, %v2620_v54  ;;  %v2693_v39 = vsel %vm2686_vm4, %v2656_v5, 0.0 }
 0x1e1   : > { %vm2557_vm10 = vcmp.ge.f32.partialorder %v2426_v53, 0.0  ;;  %v2590_v28 = vmul.f32 %v5026_v31, %v2426_v53  ;;  %v2421_v49 = vadd.f32 %v5024_v46, %v2420_v8  ;;  %v2619_v60 = vsel %vm2554_vm9, %v2411_v14, %v2587_v43 }
 0x1e2   : > { %v4093_v38 = vpop.f32.mrf.mxu1  ;;  %v2702_v26 = vsel %vm2686_vm4, %v2659_v12, 0.0  ;;  %v2658_v56 = vmul.f32 %v5034_v48, %v2619_v60 }
 0x1e3   : > { %vm2556_vm11 = vcmp.ge.f32.partialorder %v2421_v49, 0.0  ;;  %v2589_v27 = vmul.f32 %v5026_v31, %v2421_v49  ;;  %v2436_v3 = vadd.f32 %v4093_v38, %v5024_v46  ;;  %2694 = vadd.xlane.f32.xlu1 %v2693_v39  ;;  %2703 = vadd.xlane.f32.xlu0 %v2702_v26  ;;  %v2622_v45 = vsel %vm2557_vm10, %v2426_v53, %v2590_v28 }
 0x1e4   : > { %v2430_v13 = vpop.f32.mrf.mxu1  ;;  %v2661_v29 = vmul.f32 %v5034_v48, %v2622_v45  ;;  %v2699_v55 = vsel %vm2686_vm4, %v2658_v56, 0.0 }
 0x1e5   : > { %vm2559_vm12 = vcmp.ge.f32.partialorder %v2436_v3, 0.0  ;;  %v2592_v32 = vmul.f32 %v5026_v31, %v2436_v3  ;;  %v2431_v40 = vadd.f32 %v5024_v46, %v2430_v13  ;;  %v2621_v41 = vsel %vm2556_vm11, %v2421_v49, %v2589_v27 }
 0x1e6   : > { %v4096_v50 = vpop.f32.mrf.mxu1  ;;  %v2708_v35 = vsel %vm2686_vm4, %v2661_v29, 0.0  ;;  %v2660_v47 = vmul.f32 %v5034_v48, %v2621_v41 }
 0x1e7   : > { %vm2558_vm13 = vcmp.ge.f32.partialorder %v2431_v40, 0.0  ;;  %v2591_v57 = vmul.f32 %v5026_v31, %v2431_v40  ;;  %v2446_v9 = vadd.f32 %v4096_v50, %v5024_v46  ;;  %2700 = vadd.xlane.f32.xlu1 %v2699_v55  ;;  %2709 = vadd.xlane.f32.xlu0 %v2708_v35  ;;  %v2624_v44 = vsel %vm2559_vm12, %v2436_v3, %v2592_v32 }
 0x1e8   : > { %v2440_v51 = vpop.f32.mrf.mxu1  ;;  %v2705_v59 = vsel %vm2686_vm4, %v2660_v47, 0.0  ;;  %v2663_v30 = vmul.f32 %v5034_v48, %v2624_v44 }
 0x1e9   : > { %vm2561_vm14 = vcmp.ge.f32.partialorder %v2446_v9, 0.0  ;;  %v2594_v42 = vmul.f32 %v5026_v31, %v2446_v9  ;;  %v2441_v34 = vadd.f32 %v5024_v46, %v2440_v51  ;;  %v2623_v17 = vsel %vm2558_vm13, %v2431_v40, %v2591_v57 }
 0x1ea   : > { %v4099_v23 = vpop.f32.mrf.mxu1  ;;  %v2662_v58 = vmul.f32 %v5034_v48, %v2623_v17  ;;  %v2714_v4 = vsel %vm2686_vm4, %v2663_v30, 0.0 }
 0x1eb   : > { %vm2560_vm15 = vcmp.ge.f32.partialorder %v2441_v34, 0.0  ;;  %v2593_v33 = vmul.f32 %v5026_v31, %v2441_v34  ;;  %v2456_v52 = vadd.f32 %v4099_v23, %v5024_v46  ;;  %2706 = vadd.xlane.f32.xlu0 %v2705_v59  ;;  %v2626_v0 = vsel %vm2561_vm14, %v2446_v9, %v2594_v42 }
 0x1ec   : > { %v2450_v1 = vpop.f32.mrf.mxu1  ;;  %v2711_v16 = vsel %vm2686_vm4, %v2662_v58, 0.0  ;;  %v2665_v63 = vmul.f32 %v5034_v48, %v2626_v0 }
 0x1ed   : > { %vm2563_vm1 = vcmp.ge.f32.partialorder %v2456_v52, 0.0  ;;  %v2596_v62 = vmul.f32 %v5026_v31, %v2456_v52  ;;  %v2451_v10 = vadd.f32 %v5024_v46, %v2450_v1  ;;  %2712 = vadd.xlane.f32.xlu1 %v2711_v16  ;;  %v2625_v19 = vsel %vm2560_vm15, %v2441_v34, %v2593_v33 }
 0x1ee   : > { %v4102_v22 = vpop.f32.mrf.mxu1  ;;  %v2720_v15 = vsel %vm2686_vm4, %v2665_v63, 0.0  ;;  %v2664_v43 = vmul.f32 %v5034_v48, %v2625_v19 }
 0x1ef   : > { %vm2562_vm2 = vcmp.ge.f32.partialorder %v2451_v10, 0.0  ;;  %v2595_v18 = vmul.f32 %v5026_v31, %v2451_v10  ;;  %v2466_v25 = vadd.f32 %v4102_v22, %v5024_v46  ;;  %2715 = vadd.xlane.f32.xlu0 %v2714_v4  ;;  %v2628_v20 = vsel %vm2563_vm1, %v2456_v52, %v2596_v62 }
 0x1f0   : > { %v2460_v36 = vpop.f32.mrf.mxu1  ;;  %v2667_v11 = vmul.f32 %v5034_v48, %v2628_v20  ;;  %v2717_v26 = vsel %vm2686_vm4, %v2664_v43, 0.0 }
 0x1f1   : > { %vm2565_vm3 = vcmp.ge.f32.partialorder %v2466_v25, 0.0  ;;  %v2598_v37 = vmul.f32 %v5026_v31, %v2466_v25  ;;  %v2461_v14 = vadd.f32 %v5024_v46, %v2460_v36  ;;  %v2627_v61 = vsel %vm2562_vm2, %v2451_v10, %v2595_v18 }
 0x1f2   : > { %v4105_v21 = vpop.f32.mrf.mxu1  ;;  %v2726_v6 = vsel %vm2686_vm4, %v2667_v11, 0.0  ;;  %v2666_v5 = vmul.f32 %v5034_v48, %v2627_v61 }
 0x1f3   : > { %vm2564_vm5 = vcmp.ge.f32.partialorder %v2461_v14, 0.0  ;;  %v2597_v53 = vmul.f32 %v5026_v31, %v2461_v14  ;;  %v2476_v54 = vadd.f32 %v4105_v21, %v5024_v46  ;;  %2727 = vadd.xlane.f32.xlu1 %v2726_v6  ;;  %2721 = vadd.xlane.f32.xlu0 %v2720_v15  ;;  %v2630_v8 = vsel %vm2565_vm3, %v2466_v25, %v2598_v37 }
 0x1f4   : > { %v2470_v12 = vpop.f32.mrf.mxu1  ;;  %v2723_v39 = vsel %vm2686_vm4, %v2666_v5, 0.0  ;;  %v2669_v27 = vmul.f32 %v5034_v48, %v2630_v8 }
 0x1f5   : > { %vm2567_vm6 = vcmp.ge.f32.partialorder %v2476_v54, 0.0  ;;  %v2600_v28 = vmul.f32 %v5026_v31, %v2476_v54  ;;  %v2471_v49 = vadd.f32 %v5024_v46, %v2470_v12  ;;  %v2629_v60 = vsel %vm2564_vm5, %v2461_v14, %v2597_v53 }
 0x1f6   : > { %v4108_v38 = vpop.f32.mrf.mxu1  ;;  %v2668_v56 = vmul.f32 %v5034_v48, %v2629_v60  ;;  %v2732_v35 = vsel %vm2686_vm4, %v2669_v27, 0.0 }
 0x1f7   : > { %vm2566_vm7 = vcmp.ge.f32.partialorder %v2471_v49, 0.0  ;;  %v2599_v3 = vmul.f32 %v5026_v31, %v2471_v49  ;;  %v2486_v45 = vadd.f32 %v4108_v38, %v5024_v46  ;;  %2724 = vadd.xlane.f32.xlu1 %v2723_v39  ;;  %2718 = vadd.xlane.f32.xlu0 %v2717_v26  ;;  %v2632_v13 = vsel %vm2567_vm6, %v2476_v54, %v2600_v28 }
 0x1f8   : > { %v2480_v29 = vpop.f32.mrf.mxu1  ;;  %v2729_v55 = vsel %vm2686_vm4, %v2668_v56, 0.0  ;;  %v2671_v57 = vmul.f32 %v5034_v48, %v2632_v13 }
 0x1f9   : > { %vm2569_vm8 = vcmp.ge.f32.partialorder %v2486_v45, 0.0  ;;  %v2602_v32 = vmul.f32 %v5026_v31, %v2486_v45  ;;  %v2481_v40 = vadd.f32 %v5024_v46, %v2480_v29  ;;  %v2631_v41 = vsel %vm2566_vm7, %v2471_v49, %v2599_v3 }
 0x1fa   : > { %v4111_v50 = vpop.f32.mrf.mxu1  ;;  %v2670_v47 = vmul.f32 %v5034_v48, %v2631_v41  ;;  %v2738_v30 = vsel %vm2686_vm4, %v2671_v57, 0.0 }
 0x1fb   : > { %vm2568_vm9 = vcmp.ge.f32.partialorder %v2481_v40, 0.0  ;;  %v2601_v9 = vmul.f32 %v5026_v31, %v2481_v40  ;;  %v2496_v44 = vadd.f32 %v4111_v50, %v5024_v46  ;;  %2730 = vadd.xlane.f32.xlu1 %v2729_v55  ;;  %2733 = vadd.xlane.f32.xlu0 %v2732_v35  ;;  %v2634_v51 = vsel %vm2569_vm8, %v2486_v45, %v2602_v32 }
 0x1fc   : > { %v2490_v42 = vpop.f32.mrf.mxu1  ;;  %v2735_v58 = vsel %vm2686_vm4, %v2670_v47, 0.0  ;;  %v2673_v52 = vmul.f32 %v5034_v48, %v2634_v51  ;;  %vm3001_vm8 = vcmask 1042434  }
 0x1fd   : > { %vm2571_vm10 = vcmp.ge.f32.partialorder %v2496_v44, 0.0  ;;  %v2604_v34 = vmul.f32 %v5026_v31, %v2496_v44  ;;  %v2491_v17 = vadd.f32 %v5024_v46, %v2490_v42  ;;  %v2633_v23 = vsel %vm2568_vm9, %v2481_v40, %v2601_v9 }
 0x1fe   : > { %v4114_v59 = vpop.f32.mrf.mxu1  ;;  %v2672_v33 = vmul.f32 %v5034_v48, %v2633_v23  ;;  %v2744_v19 = vsel %vm2686_vm4, %v2673_v52, 0.0  ;;  %vm3003_vm9 = vcmask 1043459  }
 0x1ff   : > { %vm2570_vm11 = vcmp.ge.f32.partialorder %v2491_v17, 0.0  ;;  %v2603_v0 = vmul.f32 %v5026_v31, %v2491_v17  ;;  %v2506_v1 = vadd.f32 %v4114_v59, %v5024_v46  ;;  %2736 = vadd.xlane.f32.xlu1 %v2735_v58  ;;  %2739 = vadd.xlane.f32.xlu0 %v2738_v30  ;;  %v2636_v16 = vsel %vm2571_vm10, %v2496_v44, %v2604_v34 }
 0x200   : > { %v2500_v62 = vpop.f32.mrf.mxu1  ;;  %v2741_v63 = vsel %vm2686_vm4, %v2672_v33, 0.0  ;;  %v2675_v18 = vmul.f32 %v5034_v48, %v2636_v16  ;;  %vm3005_vm10 = vcmask 1044484  }
 0x201   : > { %vm2573_vm12 = vcmp.ge.f32.partialorder %v2506_v1, 0.0  ;;  %v2606_v10 = vmul.f32 %v5026_v31, %v2506_v1  ;;  %v2501_v22 = vadd.f32 %v5024_v46, %v2500_v62  ;;  %v2635_v25 = vsel %vm2570_vm11, %v2491_v17, %v2603_v0 }
 0x202   : > { %v4117_v4 = vpop.f32.mrf.mxu1  ;;  %v2750_v43 = vsel %vm2686_vm4, %v2675_v18, 0.0  ;;  %v2674_v54 = vmul.f32 %v5034_v48, %v2635_v25  ;;  %v2819_v18 = vld [vmem:[%s480_s30 + $0x10] sm:$0xff]  ;;  %v2820_v25 = vld [vmem:[%s480_s30 + $0x18] sm:$0xff]  ;;  %vm3007_vm11 = vcmask 1045509  }
 0x203   : > { %vm2572_vm13 = vcmp.ge.f32.partialorder %v2501_v22, 0.0  ;;  %v2605_v20 = vmul.f32 %v5026_v31, %v2501_v22  ;;  %v2516_v36 = vadd.f32 %v4117_v4, %v5024_v46  ;;  %2742 = vadd.xlane.f32.xlu1 %v2741_v63  ;;  %2745 = vadd.xlane.f32.xlu0 %v2744_v19  ;;  %v2638_v11 = vsel %vm2573_vm12, %v2506_v1, %v2606_v10 }
 0x204   : > { %v2510_v37 = vpop.f32.mrf.mxu1  ;;  %v2677_v14 = vmul.f32 %v5034_v48, %v2638_v11  ;;  %v2747_v27 = vsel %vm2686_vm4, %v2674_v54, 0.0  ;;  %vm3009_vm12 = vcmask 1046534  }
 0x205   : > { %vm2575_vm14 = vcmp.ge.f32.partialorder %v2516_v36, 0.0  ;;  %v2608_v61 = vmul.f32 %v5026_v31, %v2516_v36  ;;  %v2511_v21 = vadd.f32 %v5024_v46, %v2510_v37  ;;  %v2637_v6 = vsel %vm2572_vm13, %v2501_v22, %v2605_v20 }
 0x206   : > { %v4120_v15 = vpop.f32.mrf.mxu1  ;;  %v2756_v5 = vsel %vm2686_vm4, %v2677_v14, 0.0  ;;  %v2676_v53 = vmul.f32 %v5034_v48, %v2637_v6  ;;  %vm3011_vm13 = vcmask 1047559  }
 0x207   : > { %vm2574_vm15 = vcmp.ge.f32.partialorder %v2511_v21, 0.0  ;;  %v2607_v8 = vmul.f32 %v5026_v31, %v2511_v21  ;;  %v2526_v12 = vadd.f32 %v4120_v15, %v5024_v46  ;;  %2757 = vadd.xlane.f32.xlu1 %v2756_v5  ;;  %2751 = vadd.xlane.f32.xlu0 %v2750_v43  ;;  %v2640_v28 = vsel %vm2575_vm14, %v2516_v36, %v2608_v61 }
 0x208   : > { %v2520_v49 = vpop.f32.mrf.mxu1  ;;  %v2753_v56 = vsel %vm2686_vm4, %v2676_v53, 0.0  ;;  %v2679_v3 = vmul.f32 %v5034_v48, %v2640_v28  ;;  %vm3042_vm14 = vcmask 64512  }
 0x209   : > { %vm2577_vm1 = vcmp.ge.f32.partialorder %v2526_v12, 0.0  ;;  %v2610_v60 = vmul.f32 %v5026_v31, %v2526_v12  ;;  %v2521_v38 = vadd.f32 %v5024_v46, %v2520_v49  ;;  %v2639_v39 = vsel %vm2574_vm15, %v2511_v21, %v2607_v8 }
 0x20a   : > { %v4123_v26 = vpop.f32.mrf.mxu1  ;;  %v2678_v45 = vmul.f32 %v5034_v48, %v2639_v39  ;;  %v2762_v35 = vsel %vm2686_vm4, %v2679_v3, 0.0  ;;  %v5182_v3 = vstv %s2783_s15 }
 0x20b   : > { %vm2576_vm2 = vcmp.ge.f32.partialorder %v2521_v38, 0.0  ;;  %v2609_v13 = vmul.f32 %v5026_v31, %v2521_v38  ;;  %v2536_v29 = vadd.f32 %v4123_v26, %v5024_v46  ;;  %2754 = vadd.xlane.f32.xlu1 %v2753_v56  ;;  %2748 = vadd.xlane.f32.xlu0 %v2747_v27  ;;  %v2642_v32 = vsel %vm2577_vm1, %v2526_v12, %v2610_v60 }
 0x20c   : > { %v2530_v40 = vpop.f32.mrf.mxu1  ;;  %v2759_v47 = vsel %vm2686_vm4, %v2678_v45, 0.0  ;;  %v2681_v57 = vmul.f32 %v5034_v48, %v2642_v32  ;;  %v5176_v26 = vand.u32 127, %v602_v2 }
 0x20d   : > { %vm2579_vm3 = vcmp.ge.f32.partialorder %v2536_v29, 0.0  ;;  %v2612_v41 = vmul.f32 %v5026_v31, %v2536_v29  ;;  %v2531_v50 = vadd.f32 %v5024_v46, %v2530_v40  ;;  %v2641_v9 = vsel %vm2576_vm2, %v2521_v38, %v2609_v13 }
 0x20e   : > { %v4126_v55 = vpop.f32.mrf.mxu1  ;;  %v2768_v30 = vsel %vm2686_vm4, %v2681_v57, 0.0  ;;  %v2680_v52 = vmul.f32 %v5034_v48, %v2641_v9 }
 0x20f   : > { %vm2578_vm5 = vcmp.ge.f32.partialorder %v2531_v50, 0.0  ;;  %v2611_v44 = vmul.f32 %v5026_v31, %v2531_v50  ;;  %v2546_v51 = vadd.f32 %v4126_v55, %v5024_v46  ;;  %2763 = vadd.xlane.f32.xlu1 %v2762_v35  ;;  %2760 = vadd.xlane.f32.xlu0 %v2759_v47  ;;  %v2644_v42 = vsel %vm2579_vm3, %v2536_v29, %v2612_v41 }
 0x210   : > { %v2540_v34 = vpop.f32.mrf.mxu1  ;;  %v2683_v17 = vmul.f32 %v5034_v48, %v2644_v42  ;;  %v2765_v22 = vsel %vm2686_vm4, %v2680_v52, 0.0  ;;  %v5188_v29 = vsub.s32 %v5176_v26, %v4309_v7 }
 0x211   : > { %vm2581_vm6 = vcmp.ge.f32.partialorder %v2546_v51, 0.0  ;;  %v2614_v23 = vmul.f32 %v5026_v31, %v2546_v51  ;;  %v2541_v59 = vadd.f32 %v5024_v46, %v2540_v34  ;;  %v2643_v58 = vsel %vm2578_vm5, %v2531_v50, %v2611_v44 }
 0x212   : > { %v2774_v33 = vsel %vm2686_vm4, %v2683_v17, 0.0  ;;  %v2682_v0 = vmul.f32 %v5034_v48, %v2643_v58 }
 0x213   : > { %vm2580_vm7 = vcmp.ge.f32.partialorder %v2541_v59, 0.0  ;;  %v2613_v1 = vmul.f32 %v5026_v31, %v2541_v59  ;;  %2769 = vadd.xlane.f32.xlu1 %v2768_v30  ;;  %2775 = vadd.xlane.f32.xlu0 %v2774_v33  ;;  %v2646_v16 = vsel %vm2581_vm6, %v2546_v51, %v2614_v23  ;;  %v2817_v31 = vld [vmem:[%s480_s30] sm:$0xff] }
 0x214   : > { %v2771_v62 = vsel %vm2686_vm4, %v2682_v0, 0.0  ;;  %v2685_v46 = vmul.f32 %v5034_v48, %v2646_v16 }
 0x215   : > { %v2645_v10 = vsel %vm2580_vm7, %v2541_v59, %v2613_v1 }
 0x216   : > { %v2684_v4 = vmul.f32 %v5034_v48, %v2645_v10  ;;  %v2780_v63 = vsel %vm2686_vm4, %v2685_v46, 0.0  ;;  %v2818_v48 = vld [vmem:[%s480_s30 + $0x8] sm:$0xff] }
 0x217   : > { %2766 = vadd.xlane.f32.xlu1 %v2765_v22 }
 0x218   : > { %v2777_v19 = vsel %vm2686_vm4, %v2684_v4, 0.0  ;;  %vm2999_vm4 = vcmask 1041409  }
 0x219   : > { %2778 = vadd.xlane.f32.xlu0 %v2777_v19 }
 0x21b   : > { %2772 = vadd.xlane.f32.xlu1 %v2771_v62 }
 0x21f   : > { %2781 = vadd.xlane.f32.xlu1 %v2780_v63 }
 0x22f   : > { %2824 = vperm.xlu0 %4145, %v2817_v31  }
 0x230   : > { %2827 = vperm.xlu1 %4146, %v2818_v48  }
 0x234   : > { %2830 = vperm.xlu1 %4146, %v2819_v18  }
 0x238   : > { %2833 = vperm.xlu1 %4146, %v2820_v25  }
 0x264   : > { %v2692_v20 = vpop.xlane.xlu0 %2691 }
 0x265   : > { %v2786_v50 = vadd.f32 %v5182_v3, %v2692_v20 }
 0x267   : > { %v2878_v23 = vrot.slane %v2786_v50, %v5188_v29 }
 0x268   : > { %v2689_v36 = vpop.xlane.xlu0 %2688  ;;  %v2698_v11 = vpop.xlane.xlu1 %2697 }
 0x269   : > { %v2785_v32 = vadd.f32 %v5182_v3, %v2689_v36  ;;  %v2788_v47 = vadd.f32 %v5182_v3, %v2698_v11 }
 0x26b   : > { %v2874_v9 = vrot.slane %v2785_v32, %v5188_v29  ;;  %v2886_v33 = vrot.slane %v2788_v47, %v5188_v29 }
 0x26c   : > { %v2704_v37 = vpop.xlane.xlu0 %2703  ;;  %v2695_v14 = vpop.xlane.xlu1 %2694 }
 0x26d   : > { %v2787_v41 = vadd.f32 %v5182_v3, %v2695_v14  ;;  %v3000_v1 = vsel %vm2999_vm4, %v2878_v23, %v2874_v9  ;;  %v2790_v16 = vadd.f32 %v5182_v3, %v2704_v37 }
 0x26f   : > { %v2882_v34 = vrot.slane %v2787_v41, %v5188_v29 }
 0x270   : > { %v5171_v61 = vpop.xlane.xlu0 %2709  ;;  %v2701_v21 = vpop.xlane.xlu1 %2700 }
 0x271   : > { %v2789_v17 = vadd.f32 %v5182_v3, %v2701_v21  ;;  %v3002_v4 = vsel %vm3001_vm8, %v2882_v34, %v3000_v1  ;;  %v2894_v21 = vrot.slane %v2790_v16, %v5188_v29 }
 0x273   : > { %v2890_v63 = vrot.slane %v2789_v17, %v5188_v29 }
 0x274   : > { %v2707_v6 = vpop.xlane.xlu0 %2706 }
 0x275   : > { %v2791_v19 = vadd.f32 %v5182_v3, %v2707_v6  ;;  %v3004_v6 = vsel %vm3003_vm9, %v2886_v33, %v3002_v4 }
 0x276   : > { %v2713_v15 = vpop.xlane.xlu1 %2712 }
 0x277   : > { %v2793_v40 = vadd.f32 %v5182_v3, %v2713_v15 }
 0x278   : > { %v2716_v5 = vpop.xlane.xlu0 %2715 }
 0x279   : > { %v2794_v45 = vadd.f32 %v5182_v3, %v2716_v5  ;;  %v2906_v44 = vrot.slane %v2793_v40, %v5188_v29 }
 0x27b   : > { %v2910_v55 = vrot.slane %v2794_v45, %v5188_v29 }
 0x27c   : > { %v2728_v43 = vpop.xlane.xlu1 %2727  ;;  %v2722_v53 = vpop.xlane.xlu0 %2721 }
 0x27d   : > { %v2796_v51 = vadd.f32 %v5182_v3, %v2722_v53  ;;  %v3013_v59 = vsel %vm2999_vm4, %v2910_v55, %v2906_v44  ;;  %v2798_v31 = vadd.f32 %v5182_v3, %v2728_v43  ;;  %v3006_v53 = vsel %vm3005_vm10, %v2890_v63, %v3004_v6 }
 0x27e   : > { %v3008_v34 = vsel %vm3007_vm11, %v2894_v21, %v3006_v53 }
 0x27f   : > { %v2918_v62 = vrot.slane %v2796_v51, %v5188_v29 }
 0x280   : > { %v2725_v54 = vpop.xlane.xlu1 %2724  ;;  %v2719_v8 = vpop.xlane.xlu0 %2718 }
 0x281   : > { %v2795_v13 = vadd.f32 %v5182_v3, %v2719_v8  ;;  %v2797_v58 = vadd.f32 %v5182_v3, %v2725_v54  ;;  %v2792_v54 = vadd.f32 %v5182_v3, %v5171_v61 }
 0x283   : > { %v2914_v57 = vrot.slane %v2795_v13, %v5188_v29  ;;  %v2922_v48 = vrot.slane %v2797_v58, %v5188_v29  ;;  %v2902_v44 = vrot.slane %v2792_v54, %v5188_v29 }
 0x284   : > { %v2731_v12 = vpop.xlane.xlu1 %2730  ;;  %v5173_v28 = vpop.xlane.xlu0 %2733 }
 0x285   : > { %v3014_v52 = vsel %vm3001_vm8, %v2914_v57, %v3013_v59  ;;  %v2799_v25 = vadd.f32 %v5182_v3, %v2731_v12 }
 0x286   : > { %v3015_v18 = vsel %vm3003_vm9, %v2918_v62, %v3014_v52 }
 0x287   : > { %v3016_v12 = vsel %vm3005_vm10, %v2922_v48, %v3015_v18 }
 0x288   : > { %v2737_v49 = vpop.xlane.xlu1 %2736  ;;  %v2740_v60 = vpop.xlane.xlu0 %2739 }
 0x289   : > { %v2801_v30 = vadd.f32 %v5182_v3, %v2737_v49  ;;  %v2802_v0 = vadd.f32 %v5182_v3, %v2740_v60  ;;  %v2898_v49 = vrot.slane %v2791_v19, %v5188_v29  ;;  %v2926_v60 = vrot.slane %v2798_v31, %v5188_v29 }
 0x28b   : > { %v2938_v20 = vrot.slane %v2801_v30, %v5188_v29  ;;  %v2942_v36 = vrot.slane %v2802_v0, %v5188_v29  ;;  %v3017_v47 = vsel %vm3007_vm11, %v2926_v60, %v3016_v12  ;;  %v3010_v59 = vsel %vm3009_vm12, %v2898_v49, %v3008_v34 }
 0x28c   : > { %v2743_v38 = vpop.xlane.xlu1 %2742  ;;  %v2746_v39 = vpop.xlane.xlu0 %2745 }
 0x28d   : > { %v2803_v46 = vadd.f32 %v5182_v3, %v2743_v38  ;;  %v2804_v11 = vadd.f32 %v5182_v3, %v2746_v39  ;;  %v2930_v38 = vrot.slane %v2799_v25, %v5188_v29  ;;  %v2800_v39 = vadd.f32 %v5182_v3, %v5173_v28 }
 0x28e   : > { %v3020_v13 = vsel %vm2999_vm4, %v2942_v36, %v2938_v20 }
 0x28f   : > { %v2946_v15 = vrot.slane %v2803_v46, %v5188_v29  ;;  %v2950_v32 = vrot.slane %v2804_v11, %v5188_v29  ;;  %v2934_v51 = vrot.slane %v2800_v39, %v5188_v29 }
 0x290   : > { %v5178_v56 = vpop.xlane.xlu1 %2757  ;;  %v5180_v27 = vpop.xlane.xlu0 %2751 }
 0x291   : > { %v3021_v41 = vsel %vm3001_vm8, %v2946_v15, %v3020_v13  ;;  %v2806_v28 = vadd.f32 %v5182_v3, %v5180_v27  ;;  %v3018_v27 = vsel %vm3009_vm12, %v2930_v38, %v3017_v47 }
 0x292   : > { %v3022_v17 = vsel %vm3003_vm9, %v2950_v32, %v3021_v41 }
 0x293   : > { %v2958_v1 = vrot.slane %v2806_v28, %v5188_v29 }
 0x294   : > { %v5192_v2 = vpop.xlane.xlu1 %2754  ;;  %v2749_v35 = vpop.xlane.xlu0 %2748 }
 0x295   : > { %v2805_v5 = vadd.f32 %v5182_v3, %v2749_v35  ;;  %v2807_v58 = vadd.f32 %v5182_v3, %v5192_v2  ;;  %v2808_v2 = vadd.f32 %v5182_v3, %v5178_v56 }
 0x297   : > { %v2954_v50 = vrot.slane %v2805_v5, %v5188_v29  ;;  %v2962_v19 = vrot.slane %v2807_v58, %v5188_v29 }
 0x298   : > { %v2764_v42 = vpop.xlane.xlu1 %2763  ;;  %v2761_v10 = vpop.xlane.xlu0 %2760 }
 0x299   : > { %v2810_v37 = vadd.f32 %v5182_v3, %v2764_v42  ;;  %v2809_v14 = vadd.f32 %v5182_v3, %v2761_v10  ;;  %v3023_v30 = vsel %vm3005_vm10, %v2954_v50, %v3022_v17  ;;  %v3012_v10 = vsel %vm3011_vm13, %v2902_v44, %v3010_v59 }
 0x29a   : > { %v3024_v63 = vsel %vm3007_vm11, %v2958_v1, %v3023_v30  ;;  %v5303_v59 = vsub.s32 1, %v4309_v7 }
 0x29b   : > { %v2974_v61 = vrot.slane %v2810_v37, %v5188_v29  ;;  %v2970_v40 = vrot.slane %v2809_v14, %v5188_v29  ;;  %v3025_v37 = vsel %vm3009_vm12, %v2962_v19, %v3024_v63  ;;  %v2966_v14 = vrot.slane %v2808_v2, %v5188_v29 }
 0x29c   : > { %v2770_v22 = vpop.xlane.xlu1 %2769  ;;  %v2776_v45 = vpop.xlane.xlu0 %2775  ;;  %v5322_v2 = vsub.s32 6, %v4309_v7 }
 0x29d   : > { %v2812_v57 = vadd.f32 %v5182_v3, %v2770_v22  ;;  %v3027_v23 = vsel %vm2999_vm4, %v2974_v61, %v2970_v40  ;;  %v2814_v62 = vadd.f32 %v5182_v3, %v2776_v45  ;;  %v3019_v22 = vsel %vm3011_vm13, %v2934_v51, %v3018_v27 }
 0x29f   : > { %v2982_v16 = vrot.slane %v2812_v57, %v5188_v29  ;;  %v2990_v20 = vrot.slane %v2814_v62, %v5188_v29  ;;  %v5316_v62 = vsub.s32 4, %v4309_v7 }
 0x2a0   : > { %v2767_v43 = vpop.xlane.xlu1 %2766 }
 0x2a1   : > { %v2811_v8 = vadd.f32 %v5182_v3, %v2767_v43  ;;  %v3026_v43 = vsel %vm3011_vm13, %v2966_v14, %v3025_v37 }
 0x2a2   : > { %v2779_v42 = vpop.xlane.xlu0 %2778 }
 0x2a3   : > { %v2978_v55 = vrot.slane %v2811_v8, %v5188_v29  ;;  %v2815_v31 = vadd.f32 %v5182_v3, %v2779_v42 }
 0x2a4   : > { %v2773_v35 = vpop.xlane.xlu1 %2772 }
 0x2a5   : > { %v2813_v9 = vadd.f32 %v5182_v3, %v2773_v35  ;;  %v3028_v33 = vsel %vm3001_vm8, %v2978_v55, %v3027_v23  ;;  %v2994_v15 = vrot.slane %v2815_v31, %v5188_v29 }
 0x2a6   : > { %v3029_v4 = vsel %vm3003_vm9, %v2982_v16, %v3028_v33 }
 0x2a7   : > { %v2986_v52 = vrot.slane %v2813_v9, %v5188_v29 }
 0x2a8   : > { %v2782_v0 = vpop.xlane.xlu1 %2781 }
 0x2a9   : > { %v3030_v48 = vsel %vm3005_vm10, %v2986_v52, %v3029_v4  ;;  %v2816_v36 = vadd.f32 %v5182_v3, %v2782_v0  ;;  %v5308_v52 = vsub.s32 3, %v4309_v7  ;;  %v5311_v0 = vsub.s32 2, %v4309_v7 }
 0x2aa   : > { %v2825_v46 = vpop.permute.xlu0 %2824  ;;  %v3031_v6 = vsel %vm3007_vm11, %v2990_v20, %v3030_v48 }
 0x2ab   : > { %vm2835_vm15 = vcmp.lt.s32.totalorder %v5176_v26, %v2825_v46  ;;  %v2998_v3 = vrot.slane %v2816_v36, %v5188_v29  ;;  %v3032_v54 = vsel %vm3009_vm12, %v2994_v15, %v3031_v6  ;;  %v5319_v46 = vsub.s32 5, %v4309_v7 }
 0x2ac   : > { %v2828_v18 = vpop.permute.xlu1 %2827  ;;  %v3038_v25 = vsel %vm2835_vm15, %v3012_v10, -1e+30 }
 0x2ad   : > { %vm2836_vm1 = vcmp.lt.s32.totalorder %v5176_v26, %v2828_v18  ;;  %v3043_v56 = vsel %vm3042_vm14, %v3038_v25, -inf  ;;  %v3033_v49 = vsel %vm3011_vm13, %v2998_v3, %v3032_v54  ;;  %v3138_v18 = vsub.s32 7, %v4309_v7 }
 0x2ae   : > { %3044 = vmax.xlane.f32.xlu1 %v3043_v56  ;;  %v3039_v11 = vsel %vm2836_vm1, %v3019_v22, -1e+30 }
 0x2af   : > { %v3046_v21 = vsel %vm3042_vm14, %v3039_v11, -inf }
 0x2b0   : > { %v2831_v5 = vpop.permute.xlu1 %2830  ;;  %3047 = vmax.xlane.f32.xlu0 %v3046_v21 }
 0x2b1   : > { %vm2837_vm2 = vcmp.lt.s32.totalorder %v5176_v26, %v2831_v5 }
 0x2b2   : > { %v3040_v53 = vsel %vm2837_vm2, %v3026_v43, -1e+30 }
 0x2b3   : > { %v3049_v8 = vsel %vm3042_vm14, %v3040_v53, -inf }
 0x2b4   : > { %v2834_v12 = vpop.permute.xlu1 %2833  ;;  %3050 = vmax.xlane.f32.xlu1 %v3049_v8 }
 0x2b5   : > { %vm2838_vm3 = vcmp.lt.s32.totalorder %v5176_v26, %v2834_v12 }
 0x2b6   : > { %v3041_v60 = vsel %vm2838_vm3, %v3033_v49, -1e+30 }
 0x2b7   : > { %v3052_v38 = vsel %vm3042_vm14, %v3041_v60, -inf }
 0x2b8   : > { %3053 = vmax.xlane.f32.xlu1 %v3052_v38 }
 0x337   : > { %v3045_v29 = vpop.xlane.xlu1 %3044 }
 0x338   : > { %v3055_v39 = vsub.f32 %v3038_v25, %v3045_v29 }
 0x339   : > { %v3048_v45 = vpop.xlane.xlu0 %3047 }
 0x33a   : > { %v3059_v13 = vmul.f32 1.442695, %v3055_v39  ;;  %v3056_v32 = vsub.f32 %v3039_v11, %v3048_v45 }
 0x33c   : > { %4147 = vpow2.f32 %v3059_v13  ;;  %v3061_v61 = vmul.f32 1.442695, %v3056_v32 }
 0x33d   : > { %v3051_v40 = vpop.xlane.xlu1 %3050 }
 0x33e   : > { %4149 = vpow2.f32 %v3061_v61  ;;  %v3057_v41 = vsub.f32 %v3040_v53, %v3051_v40 }
 0x340   : > { %v3063_v50 = vmul.f32 1.442695, %v3057_v41 }
 0x341   : > { %v3054_v55 = vpop.xlane.xlu1 %3053 }
 0x342   : > { %4151 = vpow2.f32 %v3063_v50  ;;  %v3058_v26 = vsub.f32 %v3041_v60, %v3054_v55  ;;  %v4163_v55 = vld [vmem:[%s4502_s19 + $0x8] sm:$0xff] }
 0x344   : > { %v3065_v35 = vmul.f32 1.442695, %v3058_v26 }
 0x346   : > { %4153 = vpow2.f32 %v3065_v35  ;;  %v4164_v35 = vld [vmem:[%s4502_s19] sm:$0xff] }
 0x349   : > { %v4148_v47 = vpop.eup %4147 }
 0x34a   : > { %v3067_v28 = vsel %vm3042_vm14, %v4148_v47, 0.0 }
 0x34b   : > { %v4150_v57 = vpop.eup %4149  ;;  %3068 = vadd.xlane.f32.xlu1 %v3067_v28 }
 0x34c   : > { %v3070_v9 = vsel %vm3042_vm14, %v4150_v57, 0.0 }
 0x34f   : > { %v4152_v44 = vpop.eup %4151  ;;  %3071 = vadd.xlane.f32.xlu1 %v3070_v9 }
 0x350   : > { %v3073_v51 = vsel %vm3042_vm14, %v4152_v44, 0.0 }
 0x351   : > { %3074 = vadd.xlane.f32.xlu0 %v3073_v51 }
 0x353   : > { %v5298_v42 = vpop.eup %4153 }
 0x354   : > { %v3076_v34 = vsel %vm3042_vm14, %v5298_v42, 0.0 }
 0x355   : > { %3077 = vadd.xlane.f32.xlu1 %v3076_v34  ;;  %v4165_v34 = vld [vmem:[%s4502_s19 + $0x10] sm:$0xff] }
 0x3d4   : > { %v3069_v17 = vpop.xlane.xlu1 %3068 }
 0x3d5   : > { %4155 = vrcp.f32 %v3069_v17 }
 0x3d8   : > { %v3072_v23 = vpop.xlane.xlu1 %3071 }
 0x3d9   : > { %4157 = vrcp.f32 %v3072_v23  ;;  %v4166_v23 = vld [vmem:[%s4502_s19 + $0x18] sm:$0xff] }
 0x3da   : > { %v3075_v22 = vpop.xlane.xlu0 %3074 }
 0x3db   : > { %4159 = vrcp.f32 %v3075_v22 }
 0x3de   : > { %v3078_v37 = vpop.xlane.xlu1 %3077 }
 0x3df   : > { %4161 = vrcp.f32 %v3078_v37 }
 0x3e2   : > { %v4156_v27 = vpop.eup %4155 }
 0x3e3   : > { %v3083_v58 = vmul.f32 %v4156_v27, %v4148_v47 }
 0x3e5   : > { %v3090_v30 = vrot.slane %v3083_v58, %v4372_v24  ;;  %v3097_v33 = vrot.slane %v3083_v58, %v5303_v59  ;;  %v3111_v1 = vrot.slane %v3083_v58, %v5308_v52  ;;  %v3104_v16 = vrot.slane %v3083_v58, %v5311_v0 }
 0x3e6   : > { %v4158_v10 = vpop.eup %4157  ;;  %v3118_v63 = vrot.slane %v3083_v58, %v5316_v62  ;;  %v3125_v19 = vrot.slane %v3083_v58, %v5319_v46  ;;  %v3132_v31 = vrot.slane %v3083_v58, %v5322_v2  ;;  %v3139_v25 = vrot.slane %v3083_v58, %v3138_v18 }
 0x3e7   : > { %3092 = vbcast.lane.b32.xlu0 %v3090_v30, 256  ;;  %3099 = vbcast.lane.b32.xlu1 %v3097_v33, 256  ;;  %v3084_v4 = vmul.f32 %v4158_v10, %v4150_v57  ;;  %v4167_v10 = vld [vmem:[%s4502_s19 + $0x28] sm:$0xff] }
 0x3e8   : > { %v4160_v11 = vpop.eup %4159 }
 0x3e9   : > { %v3146_v48 = vrot.slane %v3084_v4, %v4372_v24  ;;  %v3174_v20 = vrot.slane %v3084_v4, %v5316_v62  ;;  %v3153_v36 = vrot.slane %v3084_v4, %v5303_v59  ;;  %v3181_v56 = vrot.slane %v3084_v4, %v5319_v46 }
 0x3ea   : > { %v3085_v14 = vmul.f32 %v4160_v11, %v4152_v44  ;;  %v3160_v21 = vrot.slane %v3084_v4, %v5311_v0  ;;  %v3188_v7 = vrot.slane %v3084_v4, %v5322_v2  ;;  %v3167_v6 = vrot.slane %v3084_v4, %v5308_v52 }
 0x3eb   : > { %3113 = vbcast.lane.b32.xlu0 %v3111_v1, 256  ;;  %3106 = vbcast.lane.b32.xlu1 %v3104_v16, 256  ;;  %v3195_v5 = vrot.slane %v3084_v4, %v3138_v18 }
 0x3ec   : > { %v3202_v15 = vrot.slane %v3085_v14, %v4372_v24  ;;  %v3216_v3 = vrot.slane %v3085_v14, %v5311_v0  ;;  %v3209_v43 = vrot.slane %v3085_v14, %v5303_v59  ;;  %v3244_v53 = vrot.slane %v3085_v14, %v5322_v2  ;;  %v4162_v54 = vpop.eup %4161 }
 0x3ed   : > { %v3086_v8 = vmul.f32 %v4162_v54, %v5298_v42  ;;  %v3223_v12 = vrot.slane %v3085_v14, %v5308_v52  ;;  %v3251_v49 = vrot.slane %v3085_v14, %v3138_v18  ;;  %v3230_v60 = vrot.slane %v3085_v14, %v5316_v62 }
 0x3ee   : > { %v3237_v29 = vrot.slane %v3085_v14, %v5319_v46 }
 0x3ef   : > { %3120 = vbcast.lane.b32.xlu0 %v3118_v63, 256  ;;  %3127 = vbcast.lane.b32.xlu1 %v3125_v19, 256  ;;  %v3265_v38 = vrot.slane %v3086_v8, %v5303_v59  ;;  %v3272_v39 = vrot.slane %v3086_v8, %v5311_v0  ;;  %v3258_v45 = vrot.slane %v3086_v8, %v4372_v24 }
 0x3f0   : > { %v3279_v13 = vrot.slane %v3086_v8, %v5308_v52  ;;  %v3293_v32 = vrot.slane %v3086_v8, %v5319_v46  ;;  %v3286_v61 = vrot.slane %v3086_v8, %v5316_v62  ;;  %v3300_v40 = vrot.slane %v3086_v8, %v5322_v2  ;;  %v4168_v2 = vld [vmem:[%s4502_s19 + $0x20] sm:$0xff] }
 0x3f1   : > { %v3307_v41 = vrot.slane %v3086_v8, %v3138_v18 }
 0x3f3   : > { %3134 = vbcast.lane.b32.xlu1 %v3132_v31, 256  ;;  %3148 = vbcast.lane.b32.xlu0 %v3146_v48, 256 }
 0x3f7   : > { %3141 = vbcast.lane.b32.xlu1 %v3139_v25, 256  ;;  %3176 = vbcast.lane.b32.xlu0 %v3174_v20, 256 }
 0x3fb   : > { %3155 = vbcast.lane.b32.xlu1 %v3153_v36, 256  ;;  %3183 = vbcast.lane.b32.xlu0 %v3181_v56, 256 }
 0x3ff   : > { %3162 = vbcast.lane.b32.xlu1 %v3160_v21, 256  ;;  %3190 = vbcast.lane.b32.xlu0 %v3188_v7, 256 }
 0x403   : > { %3169 = vbcast.lane.b32.xlu1 %v3167_v6, 256  ;;  %3204 = vbcast.lane.b32.xlu0 %v3202_v15, 256  ;;  %v4169_v6 = vld [vmem:[%s4502_s19 + $0x30] sm:$0xff] }
 0x407   : > { %3197 = vbcast.lane.b32.xlu1 %v3195_v5, 256  ;;  %3218 = vbcast.lane.b32.xlu0 %v3216_v3, 256  ;;  %v4170_v5 = vld [vmem:[%s4502_s19 + $0x40] sm:$0xff] }
 0x40b   : > { %3211 = vbcast.lane.b32.xlu1 %v3209_v43, 256  ;;  %3246 = vbcast.lane.b32.xlu0 %v3244_v53, 256 }
 0x40f   : > { %3225 = vbcast.lane.b32.xlu1 %v3223_v12, 256  ;;  %3253 = vbcast.lane.b32.xlu0 %v3251_v49, 256 }
 0x413   : > { %3232 = vbcast.lane.b32.xlu1 %v3230_v60, 256  ;;  %3267 = vbcast.lane.b32.xlu0 %v3265_v38, 256 }
 0x417   : > { %3239 = vbcast.lane.b32.xlu1 %v3237_v29, 256  ;;  %3274 = vbcast.lane.b32.xlu0 %v3272_v39, 256 }
 0x41b   : > { %3260 = vbcast.lane.b32.xlu1 %v3258_v45, 256  ;;  %3281 = vbcast.lane.b32.xlu0 %v3279_v13, 256 }
 0x41f   : > { %3295 = vbcast.lane.b32.xlu1 %v3293_v32, 256  ;;  %3288 = vbcast.lane.b32.xlu0 %v3286_v61, 256 }
 0x423   : > { %3302 = vbcast.lane.b32.xlu1 %v3300_v40, 256  ;;  %3309 = vbcast.lane.b32.xlu0 %v3307_v41, 256 }
 0x459   : > { %v3100_v50 = vpop.permute.xlu1 %3099  ;;  %v3093_v24 = vpop.permute.xlu0 %3092 }
 0x45a   : > { %v3312_v26 = vmul.f32 %v4163_v55, %v3100_v50  ;;  %v3311_v47 = vmul.f32 %v4164_v35, %v3093_v24  ;;  %v4171_v24 = vld [vmem:[%s4502_s19 + $0x38] sm:$0xff] }
 0x45c   : > { %v3350_v28 = vsel %vm791_vm0, %v3312_v26, 0.0  ;;  %v3343_v57 = vsel %vm791_vm0, %v3311_v47, 0.0 }
 0x45d   : > { %v3351_v9 = vrot.slane %v3350_v28, 4  ;;  %v3344_v44 = vrot.slane %v3343_v57, 4  ;;  %v3107_v51 = vpop.permute.xlu1 %3106  ;;  %v3114_v42 = vpop.permute.xlu0 %3113 }
 0x45e   : > { %v3313_v17 = vmul.f32 %v4165_v34, %v3107_v51  ;;  %v3314_v59 = vmul.f32 %v4166_v23, %v3114_v42 }
 0x45f   : > { %v3352_v27 = vadd.f32 %v3351_v9, %v3350_v28  ;;  %v3345_v58 = vadd.f32 %v3344_v44, %v3343_v57  ;;  %v4172_v28 = vld [vmem:[%s4502_s19 + $0x60] sm:$0xff] }
 0x460   : > { %v3357_v30 = vsel %vm791_vm0, %v3313_v17, 0.0  ;;  %v3364_v33 = vsel %vm791_vm0, %v3314_v59, 0.0 }
 0x461   : > { %v3353_v52 = vrot.slane %v3352_v27, 2  ;;  %v3346_v0 = vrot.slane %v3345_v58, 2  ;;  %v3358_v1 = vrot.slane %v3357_v30, 4  ;;  %v3365_v16 = vrot.slane %v3364_v33, 4  ;;  %v3128_v62 = vpop.permute.xlu1 %3127  ;;  %v3121_v46 = vpop.permute.xlu0 %3120 }
 0x462   : > { %v3316_v22 = vmul.f32 %v4167_v10, %v3128_v62  ;;  %v3315_v4 = vmul.f32 %v4168_v2, %v3121_v46  ;;  %v4173_v46 = vld [vmem:[%s4502_s19 + $0x48] sm:$0xff] }
 0x463   : > { %v3354_v63 = vadd.f32 %v3353_v52, %v3352_v27  ;;  %v3347_v19 = vadd.f32 %v3346_v0, %v3345_v58  ;;  %v3359_v31 = vadd.f32 %v3358_v1, %v3357_v30  ;;  %v3366_v48 = vadd.f32 %v3365_v16, %v3364_v33 }
 0x464   : > { %v3378_v18 = vsel %vm791_vm0, %v3316_v22, 0.0  ;;  %v3371_v25 = vsel %vm791_vm0, %v3315_v4, 0.0 }
 0x465   : > { %v3355_v20 = vrot.slane %v3354_v63, 1  ;;  %v3348_v36 = vrot.slane %v3347_v19, 1  ;;  %v3360_v56 = vrot.slane %v3359_v31, 2  ;;  %v3367_v11 = vrot.slane %v3366_v48, 2  ;;  %v3135_v37 = vpop.permute.xlu1 %3134  ;;  %v3149_v14 = vpop.permute.xlu0 %3148 }
 0x466   : > { %v3379_v21 = vrot.slane %v3378_v18, 4  ;;  %v3372_v7 = vrot.slane %v3371_v25, 4  ;;  %v3317_v15 = vmul.f32 %v4169_v6, %v3135_v37  ;;  %v3319_v3 = vmul.f32 %v4170_v5, %v3149_v14 }
 0x467   : > { %v3356_v43 = vadd.f32 %v3355_v20, %v3354_v63  ;;  %v3349_v53 = vadd.f32 %v3348_v36, %v3347_v19  ;;  %v3361_v54 = vadd.f32 %v3360_v56, %v3359_v31  ;;  %v3368_v8 = vadd.f32 %v3367_v11, %v3366_v48  ;;  %v4174_v63 = vld [vmem:[%s4502_s19 + $0x68] sm:$0xff] }
 0x468   : > { %v3380_v12 = vadd.f32 %v3379_v21, %v3378_v18  ;;  %v3373_v49 = vadd.f32 %v3372_v7, %v3371_v25  ;;  %v3385_v60 = vsel %vm791_vm0, %v3317_v15, 0.0  ;;  %v3399_v38 = vsel %vm791_vm0, %v3319_v3, 0.0 }
 0x469   : > { %v3599_v29 = vsel %vm2999_vm4, %v3356_v43, %v3349_v53  ;;  %v3362_v39 = vrot.slane %v3361_v54, 1  ;;  %v3369_v45 = vrot.slane %v3368_v8, 1  ;;  %v3386_v13 = vrot.slane %v3385_v60, 4  ;;  %v3142_v32 = vpop.permute.xlu1 %3141  ;;  %v3177_v61 = vpop.permute.xlu0 %3176  ;;  %v4175_v53 = vld [vmem:[%s4502_s19 + $0x50] sm:$0xff] }
 0x46a   : > { %v3381_v40 = vrot.slane %v3380_v12, 2  ;;  %v3374_v41 = vrot.slane %v3373_v49, 2  ;;  %v3400_v50 = vrot.slane %v3399_v38, 4  ;;  %v3318_v55 = vmul.f32 %v4171_v24, %v3142_v32 }
 0x46b   : > { %v3363_v26 = vadd.f32 %v3362_v39, %v3361_v54  ;;  %v3370_v35 = vadd.f32 %v3369_v45, %v3368_v8  ;;  %v3387_v47 = vadd.f32 %v3386_v13, %v3385_v60  ;;  %v3323_v57 = vmul.f32 %v4172_v28, %v3177_v61  ;;  %v4176_v60 = vld [vmem:[%s4502_s19 + $0x70] sm:$0xff]  ;;  %v4177_v61 = vld [vmem:[%s4502_s19 + $0x58] sm:$0xff] }
 0x46c   : > { %v3382_v9 = vadd.f32 %v3381_v40, %v3380_v12  ;;  %v3375_v44 = vadd.f32 %v3374_v41, %v3373_v49  ;;  %v3401_v51 = vadd.f32 %v3400_v50, %v3399_v38  ;;  %v3392_v42 = vsel %vm791_vm0, %v3318_v55, 0.0 }
 0x46d   : > { %v3600_v34 = vsel %vm3001_vm8, %v3363_v26, %v3599_v29  ;;  %v3388_v17 = vrot.slane %v3387_v47, 2  ;;  %v3393_v23 = vrot.slane %v3392_v42, 4  ;;  %v3427_v59 = vsel %vm791_vm0, %v3323_v57, 0.0  ;;  %v3156_v27 = vpop.permute.xlu1 %3155  ;;  %v3184_v58 = vpop.permute.xlu0 %3183 }
 0x46e   : > { %v3601_v30 = vsel %vm3003_vm9, %v3370_v35, %v3600_v34  ;;  %v3383_v33 = vrot.slane %v3382_v9, 1  ;;  %v3376_v52 = vrot.slane %v3375_v44, 1  ;;  %v3402_v0 = vrot.slane %v3401_v51, 2 }
 0x46f   : > { %v3389_v1 = vadd.f32 %v3388_v17, %v3387_v47  ;;  %v3394_v16 = vadd.f32 %v3393_v23, %v3392_v42  ;;  %v3428_v62 = vrot.slane %v3427_v59, 4  ;;  %v3320_v10 = vmul.f32 %v4173_v46, %v3156_v27  ;;  %v4178_v27 = vld [vmem:[%s4502_s19 + $0x80] sm:$0xff] }
 0x470   : > { %v3384_v22 = vadd.f32 %v3383_v33, %v3382_v9  ;;  %v3377_v2 = vadd.f32 %v3376_v52, %v3375_v44  ;;  %v3403_v4 = vadd.f32 %v3402_v0, %v3401_v51  ;;  %v3324_v19 = vmul.f32 %v4174_v63, %v3184_v58  ;;  %v4179_v52 = vld [vmem:[%s4502_s19 + $0x78] sm:$0xff] }
 0x471   : > { %v3390_v31 = vrot.slane %v3389_v1, 1  ;;  %v3395_v48 = vrot.slane %v3394_v16, 2  ;;  %v3429_v18 = vadd.f32 %v3428_v62, %v3427_v59  ;;  %v3406_v25 = vsel %vm791_vm0, %v3320_v10, 0.0  ;;  %v3163_v20 = vpop.permute.xlu1 %3162  ;;  %v3191_v36 = vpop.permute.xlu0 %3190 }
 0x472   : > { %v3602_v56 = vsel %vm3005_vm10, %v3377_v2, %v3601_v30  ;;  %v3404_v11 = vrot.slane %v3403_v4, 1  ;;  %v3407_v37 = vrot.slane %v3406_v25, 4  ;;  %v3434_v14 = vsel %vm791_vm0, %v3324_v19, 0.0 }
 0x473   : > { %v3391_v21 = vadd.f32 %v3390_v31, %v3389_v1  ;;  %v3603_v7 = vsel %vm3007_vm11, %v3384_v22, %v3602_v56  ;;  %v3396_v6 = vadd.f32 %v3395_v48, %v3394_v16  ;;  %v3430_v15 = vrot.slane %v3429_v18, 2  ;;  %v4180_v1 = vld [vmem:[%s4502_s19 + $0x90] sm:$0xff] }
 0x474   : > { %v3405_v5 = vadd.f32 %v3404_v11, %v3403_v4  ;;  %v3408_v3 = vadd.f32 %v3407_v37, %v3406_v25  ;;  %v3435_v43 = vrot.slane %v3434_v14, 4  ;;  %v3321_v54 = vmul.f32 %v4175_v53, %v3163_v20 }
 0x475   : > { %v3604_v8 = vsel %vm3009_vm12, %v3391_v21, %v3603_v7  ;;  %v3397_v12 = vrot.slane %v3396_v6, 1  ;;  %v3431_v49 = vadd.f32 %v3430_v15, %v3429_v18  ;;  %v3325_v38 = vmul.f32 %v4176_v60, %v3191_v36  ;;  %v3170_v29 = vpop.permute.xlu1 %3169  ;;  %v3205_v39 = vpop.permute.xlu0 %3204  ;;  %v4181_v15 = vld [vmem:[%s4502_s19 + $0x88] sm:$0xff] }
 0x476   : > { %v3409_v45 = vrot.slane %v3408_v3, 2  ;;  %v3436_v13 = vadd.f32 %v3435_v43, %v3434_v14  ;;  %v3413_v32 = vsel %vm791_vm0, %v3321_v54, 0.0  ;;  %v3322_v40 = vmul.f32 %v4177_v61, %v3170_v29 }
 0x477   : > { %v3398_v41 = vadd.f32 %v3397_v12, %v3396_v6  ;;  %v3432_v50 = vrot.slane %v3431_v49, 1  ;;  %v3414_v24 = vrot.slane %v3413_v32, 4  ;;  %v3441_v55 = vsel %vm791_vm0, %v3325_v38, 0.0 }
 0x478   : > { %v3410_v26 = vadd.f32 %v3409_v45, %v3408_v3  ;;  %v3437_v35 = vrot.slane %v3436_v13, 2  ;;  %v3442_v47 = vrot.slane %v3441_v55, 4  ;;  %v3420_v28 = vsel %vm791_vm0, %v3322_v40, 0.0 }
 0x479   : > { %v3605_v57 = vsel %vm3011_vm13, %v3398_v41, %v3604_v8  ;;  %v5394_v9 = vadd.f32 %v3432_v50, %v3431_v49  ;;  %v3415_v44 = vadd.f32 %v3414_v24, %v3413_v32  ;;  %v3421_v51 = vrot.slane %v3420_v28, 4  ;;  %v3198_v42 = vpop.permute.xlu1 %3197  ;;  %v3219_v34 = vpop.permute.xlu0 %3218  ;;  %v4182_v8 = vld [vmem:[%s4502_s19 + $0xb0] sm:$0xff]  ;;  %v4183_v24 = vld [vmem:[%s4502_s19 + $0x98] sm:$0xff] }
 0x47a   : > { %3631 = vst.msk [vmem:[%s5389_s12] sm:$0xff] %vm791_vm0, %v3605_v57  ;;  %v3411_v17 = vrot.slane %v3410_v26, 1  ;;  %v3438_v23 = vadd.f32 %v3437_v35, %v3436_v13  ;;  %v3443_v59 = vadd.f32 %v3442_v47, %v3441_v55  ;;  %v3327_v58 = vmul.f32 %v4178_v27, %v3205_v39 }
 0x47b   : > { %v3416_v30 = vrot.slane %v3415_v44, 2  ;;  %v3422_v33 = vadd.f32 %v3421_v51, %v3420_v28  ;;  %v3326_v0 = vmul.f32 %v4179_v52, %v3198_v42  ;;  %v3329_v16 = vmul.f32 %v4180_v1, %v3219_v34 }
 0x47c   : > { %v3412_v62 = vadd.f32 %v3411_v17, %v3410_v26  ;;  %v3439_v46 = vrot.slane %v3438_v23, 1  ;;  %v3444_v10 = vrot.slane %v3443_v59, 2  ;;  %v3455_v22 = vsel %vm791_vm0, %v3327_v58, 0.0 }
 0x47d   : > { %v3417_v2 = vadd.f32 %v3416_v30, %v3415_v44  ;;  %v3423_v4 = vrot.slane %v3422_v33, 2  ;;  %v3456_v63 = vrot.slane %v3455_v22, 4  ;;  %v3448_v19 = vsel %vm791_vm0, %v3326_v0, 0.0  ;;  %v3212_v31 = vpop.permute.xlu1 %3211  ;;  %v3247_v48 = vpop.permute.xlu0 %3246 }
 0x47e   : > { %v3606_v18 = vsel %vm2999_vm4, %v3412_v62, %v3405_v5  ;;  %v3440_v25 = vadd.f32 %v3439_v46, %v3438_v23  ;;  %v3445_v20 = vadd.f32 %v3444_v10, %v3443_v59  ;;  %v3449_v36 = vrot.slane %v3448_v19, 4 }
 0x47f   : > { %v3418_v56 = vrot.slane %v3417_v2, 1  ;;  %v3424_v11 = vadd.f32 %v3423_v4, %v3422_v33  ;;  %v3457_v37 = vadd.f32 %v3456_v63, %v3455_v22  ;;  %v3469_v14 = vsel %vm791_vm0, %v3329_v16, 0.0  ;;  %v4184_v16 = vld [vmem:[%s4502_s19 + $0xb8] sm:$0xff] }
 0x480   : > { %v3446_v21 = vrot.slane %v3445_v20, 1  ;;  %v3450_v7 = vadd.f32 %v3449_v36, %v3448_v19  ;;  %v3470_v6 = vrot.slane %v3469_v14, 4  ;;  %v3328_v3 = vmul.f32 %v4181_v15, %v3212_v31  ;;  %v4186_v19 = vld [vmem:[%s4502_s19 + $0xc8] sm:$0xff] }
 0x481   : > { %v3419_v43 = vadd.f32 %v3418_v56, %v3417_v2  ;;  %v3425_v53 = vrot.slane %v3424_v11, 1  ;;  %v3458_v54 = vrot.slane %v3457_v37, 2  ;;  %v3333_v5 = vmul.f32 %v4182_v8, %v3247_v48  ;;  %v3226_v12 = vpop.permute.xlu1 %3225  ;;  %v3254_v49 = vpop.permute.xlu0 %3253  ;;  %v4188_v8 = vld [vmem:[%s4502_s19 + $0xd0] sm:$0xff] }
 0x482   : > { %v3447_v60 = vadd.f32 %v3446_v21, %v3445_v20  ;;  %v3451_v38 = vrot.slane %v3450_v7, 2  ;;  %v3471_v29 = vadd.f32 %v3470_v6, %v3469_v14  ;;  %v3462_v39 = vsel %vm791_vm0, %v3328_v3, 0.0  ;;  %v4187_v6 = vld [vmem:[%s4502_s19 + $0xa8] sm:$0xff] }
 0x483   : > { %v3607_v45 = vsel %vm3001_vm8, %v3419_v43, %v3606_v18  ;;  %v3426_v13 = vadd.f32 %v3425_v53, %v3424_v11  ;;  %v3459_v32 = vadd.f32 %v3458_v54, %v3457_v37  ;;  %v3463_v61 = vrot.slane %v3462_v39, 4 }
 0x484   : > { %v3452_v40 = vadd.f32 %v3451_v38, %v3450_v7  ;;  %v3472_v41 = vrot.slane %v3471_v29, 2  ;;  %v3497_v50 = vsel %vm791_vm0, %v3333_v5, 0.0  ;;  %v3330_v55 = vmul.f32 %v4183_v24, %v3226_v12 }
 0x485   : > { %v3608_v26 = vsel %vm3003_vm9, %v3426_v13, %v3607_v45  ;;  %v3460_v35 = vrot.slane %v3459_v32, 1  ;;  %v3464_v47 = vadd.f32 %v3463_v61, %v3462_v39  ;;  %v3498_v28 = vrot.slane %v3497_v50, 4  ;;  %v3233_v57 = vpop.permute.xlu1 %3232  ;;  %v3268_v44 = vpop.permute.xlu0 %3267 }
 0x486   : > { %v3609_v51 = vsel %vm3005_vm10, %v5394_v9, %v3608_v26  ;;  %v3453_v42 = vrot.slane %v3452_v40, 1  ;;  %v3473_v34 = vadd.f32 %v3472_v41, %v3471_v29  ;;  %v3476_v17 = vsel %vm791_vm0, %v3330_v55, 0.0  ;;  %v4185_v9 = vld [vmem:[%s4502_s19 + $0xa0] sm:$0xff] }
 0x487   : > { %v3610_v23 = vsel %vm3007_vm11, %v3440_v25, %v3609_v51  ;;  %v3465_v59 = vrot.slane %v3464_v47, 2  ;;  %v3499_v27 = vadd.f32 %v3498_v28, %v3497_v50  ;;  %v3461_v58 = vadd.f32 %v3460_v35, %v3459_v32  ;;  %v4189_v50 = vld [vmem:[%s4502_s19 + $0xc0] sm:$0xff] }
 0x488   : > { %v3454_v30 = vadd.f32 %v3453_v42, %v3452_v40  ;;  %v3611_v33 = vsel %vm3009_vm12, %v3447_v60, %v3610_v23  ;;  %v3477_v52 = vrot.slane %v3476_v17, 4  ;;  %v3334_v62 = vmul.f32 %v4184_v16, %v3254_v49  ;;  %v4190_v42 = vld [vmem:[%s4502_s19 + $0xd8] sm:$0xff] }
 0x489   : > { %v3466_v0 = vadd.f32 %v3465_v59, %v3464_v47  ;;  %v3500_v1 = vrot.slane %v3499_v27, 2  ;;  %v3331_v46 = vmul.f32 %v4185_v9, %v3233_v57  ;;  %v3240_v10 = vpop.permute.xlu1 %3239  ;;  %v3275_v22 = vpop.permute.xlu0 %3274  ;;  %v3474_v4 = vrot.slane %v3473_v34, 1 }
 0x48a   : > { %v3612_v2 = vsel %vm3011_vm13, %v3454_v30, %v3611_v33  ;;  %v3478_v63 = vadd.f32 %v3477_v52, %v3476_v17  ;;  %v3336_v31 = vmul.f32 %v4186_v19, %v3268_v44  ;;  %v3504_v25 = vsel %vm791_vm0, %v3334_v62, 0.0 }
 0x48b   : > { %3632 = vst.msk [vmem:[%s5389_s12 + $0x8] sm:$0xff] %vm791_vm0, %v3612_v2  ;;  %v3467_v48 = vrot.slane %v3466_v0, 1  ;;  %v3501_v18 = vadd.f32 %v3500_v1, %v3499_v27  ;;  %v3483_v20 = vsel %vm791_vm0, %v3331_v46, 0.0  ;;  %v3505_v56 = vrot.slane %v3504_v25, 4 }
 0x48c   : > { %v3479_v36 = vrot.slane %v3478_v63, 2  ;;  %v3484_v11 = vrot.slane %v3483_v20, 4  ;;  %v3518_v37 = vsel %vm791_vm0, %v3336_v31, 0.0  ;;  %v3332_v15 = vmul.f32 %v4187_v6, %v3240_v10 }
 0x48d   : > { %v3468_v14 = vadd.f32 %v3467_v48, %v3466_v0  ;;  %v3502_v21 = vrot.slane %v3501_v18, 1  ;;  %v3519_v7 = vrot.slane %v3518_v37, 4  ;;  %v3261_v3 = vpop.permute.xlu1 %3260  ;;  %v3506_v53 = vadd.f32 %v3505_v56, %v3504_v25  ;;  %v3282_v12 = vpop.permute.xlu0 %3281 }
 0x48e   : > { %v3480_v43 = vadd.f32 %v3479_v36, %v3478_v63  ;;  %v3485_v54 = vadd.f32 %v3484_v11, %v3483_v20  ;;  %v3337_v5 = vmul.f32 %v4188_v8, %v3275_v22  ;;  %v3475_v49 = vadd.f32 %v3474_v4, %v3473_v34  ;;  %v4191_v4 = vld [vmem:[%s4502_s19 + $0xe8] sm:$0xff]  ;;  %v4193_v11 = vld [vmem:[%s4502_s19 + $0xf0] sm:$0xff] }
 0x48f   : > { %v3613_v60 = vsel %vm2999_vm4, %v3468_v14, %v3461_v58  ;;  %v3520_v38 = vadd.f32 %v3519_v7, %v3518_v37  ;;  %v3490_v29 = vsel %vm791_vm0, %v3332_v15, 0.0  ;;  %v5430_v39 = vadd.f32 %v3502_v21, %v3501_v18  ;;  %v4192_v18 = vld [vmem:[%s4502_s19 + $0xe0] sm:$0xff] }
 0x490   : > { %v3481_v45 = vrot.slane %v3480_v43, 1  ;;  %v3507_v13 = vrot.slane %v3506_v53, 2  ;;  %v3486_v32 = vrot.slane %v3485_v54, 2  ;;  %v3491_v40 = vrot.slane %v3490_v29, 4 }
 0x491   : > { %v3521_v61 = vrot.slane %v3520_v38, 2  ;;  %v3525_v41 = vsel %vm791_vm0, %v3337_v5, 0.0  ;;  %v3335_v24 = vmul.f32 %v4189_v50, %v3261_v3  ;;  %v3296_v55 = vpop.permute.xlu1 %3295  ;;  %v3338_v34 = vmul.f32 %v4190_v42, %v3282_v12  ;;  %v3289_v58 = vpop.permute.xlu0 %3288 }
 0x492   : > { %v3482_v26 = vadd.f32 %v3481_v45, %v3480_v43  ;;  %v3508_v35 = vadd.f32 %v3507_v13, %v3506_v53  ;;  %v3487_v47 = vadd.f32 %v3486_v32, %v3485_v54  ;;  %v3526_v28 = vrot.slane %v3525_v41, 4  ;;  %v4194_v45 = vld [vmem:[%s4502_s19 + $0xf8] sm:$0xff] }
 0x493   : > { %v3522_v57 = vadd.f32 %v3521_v61, %v3520_v38  ;;  %v3492_v44 = vadd.f32 %v3491_v40, %v3490_v29  ;;  %v3511_v51 = vsel %vm791_vm0, %v3335_v24, 0.0  ;;  %v3614_v17 = vsel %vm3001_vm8, %v3475_v49, %v3613_v60 }
 0x494   : > { %v3509_v23 = vrot.slane %v3508_v35, 1  ;;  %v3488_v59 = vrot.slane %v3487_v47, 1  ;;  %v3527_v27 = vadd.f32 %v3526_v28, %v3525_v41  ;;  %v3512_v52 = vrot.slane %v3511_v51, 4 }
 0x495   : > { %v3523_v30 = vrot.slane %v3522_v57, 1  ;;  %v3493_v33 = vrot.slane %v3492_v44, 2  ;;  %v3532_v0 = vsel %vm791_vm0, %v3338_v34, 0.0  ;;  %v3615_v1 = vsel %vm3003_vm9, %v3482_v26, %v3614_v17  ;;  %v3303_v46 = vpop.permute.xlu1 %3302  ;;  %v3310_v15 = vpop.permute.xlu0 %3309 }
 0x496   : > { %v3489_v16 = vadd.f32 %v3488_v59, %v3487_v47  ;;  %v3528_v62 = vrot.slane %v3527_v27, 2  ;;  %v3533_v9 = vrot.slane %v3532_v0, 4  ;;  %v3510_v10 = vadd.f32 %v3509_v23, %v3508_v35 }
 0x497   : > { %v3494_v22 = vadd.f32 %v3493_v33, %v3492_v44  ;;  %v3513_v2 = vadd.f32 %v3512_v52, %v3511_v51  ;;  %v3340_v63 = vmul.f32 %v4191_v4, %v3296_v55  ;;  %v3524_v19 = vadd.f32 %v3523_v30, %v3522_v57 }
 0x498   : > { %v3529_v31 = vadd.f32 %v3528_v62, %v3527_v27  ;;  %v3534_v48 = vadd.f32 %v3533_v9, %v3532_v0  ;;  %v3339_v25 = vmul.f32 %v4192_v18, %v3289_v58  ;;  %v3341_v37 = vmul.f32 %v4193_v11, %v3303_v46 }
 0x499   : > { %v3495_v20 = vrot.slane %v3494_v22, 1  ;;  %v3514_v36 = vrot.slane %v3513_v2, 2  ;;  %v3546_v56 = vsel %vm791_vm0, %v3340_v63, 0.0  ;;  %v3616_v14 = vsel %vm3005_vm10, %v3489_v16, %v3615_v1 }
 0x49a   : > { %v3535_v21 = vrot.slane %v3534_v48, 2  ;;  %v3547_v7 = vrot.slane %v3546_v56, 4  ;;  %v3539_v6 = vsel %vm791_vm0, %v3339_v25, 0.0  ;;  %v3553_v54 = vsel %vm791_vm0, %v3341_v37, 0.0 }
 0x49b   : > { %v3496_v3 = vadd.f32 %v3495_v20, %v3494_v22  ;;  %v3515_v43 = vadd.f32 %v3514_v36, %v3513_v2  ;;  %v3540_v53 = vrot.slane %v3539_v6, 4  ;;  %v3530_v8 = vrot.slane %v3529_v31, 1 }
 0x49c   : > { %v3536_v5 = vadd.f32 %v3535_v21, %v3534_v48  ;;  %v3548_v12 = vadd.f32 %v3547_v7, %v3546_v56  ;;  %v3554_v49 = vrot.slane %v3553_v54, 4  ;;  %v3342_v13 = vmul.f32 %v4194_v45, %v3310_v15 }
 0x49d   : > { %v3617_v60 = vsel %vm3007_vm11, %v3496_v3, %v3616_v14  ;;  %v3516_v38 = vrot.slane %v3515_v43, 1  ;;  %v3541_v29 = vadd.f32 %v3540_v53, %v3539_v6  ;;  %v3531_v35 = vadd.f32 %v3530_v8, %v3529_v31 }
 0x49e   : > { %v3618_v32 = vsel %vm3009_vm12, %v5430_v39, %v3617_v60  ;;  %v3537_v61 = vrot.slane %v3536_v5, 1  ;;  %v3549_v40 = vrot.slane %v3548_v12, 2  ;;  %v3555_v41 = vadd.f32 %v3554_v49, %v3553_v54 }
 0x49f   : > { %v3619_v50 = vsel %vm3011_vm13, %v3510_v10, %v3618_v32  ;;  %v3517_v24 = vadd.f32 %v3516_v38, %v3515_v43  ;;  %v3542_v55 = vrot.slane %v3541_v29, 2  ;;  %v3560_v26 = vsel %vm791_vm0, %v3342_v13, 0.0 }
 0x4a0   : > { %3633 = vst.msk [vmem:[%s5389_s12 + $0x10] sm:$0xff] %vm791_vm0, %v3619_v50  ;;  %v3550_v47 = vadd.f32 %v3549_v40, %v3548_v12  ;;  %v3556_v28 = vrot.slane %v3555_v41, 2  ;;  %v3561_v57 = vrot.slane %v3560_v26, 4  ;;  %v3538_v51 = vadd.f32 %v3537_v61, %v3536_v5 }
 0x4a1   : > { %v3620_v44 = vsel %vm2999_vm4, %v3524_v19, %v3517_v24  ;;  %v3543_v42 = vadd.f32 %v3542_v55, %v3541_v29 }
 0x4a2   : > { %v3621_v39 = vsel %vm3001_vm8, %v3531_v35, %v3620_v44  ;;  %v3551_v34 = vrot.slane %v3550_v47, 1  ;;  %v3557_v17 = vadd.f32 %v3556_v28, %v3555_v41  ;;  %v3562_v23 = vadd.f32 %v3561_v57, %v3560_v26 }
 0x4a3   : > { %v3544_v59 = vrot.slane %v3543_v42, 1  ;;  %v3622_v27 = vsel %vm3003_vm9, %v3538_v51, %v3621_v39 }
 0x4a4   : > { %v3552_v58 = vadd.f32 %v3551_v34, %v3550_v47  ;;  %v3558_v30 = vrot.slane %v3557_v17, 1  ;;  %v3563_v33 = vrot.slane %v3562_v23, 2 }
 0x4a5   : > { %v3545_v52 = vadd.f32 %v3544_v59, %v3543_v42 }
 0x4a6   : > { %v3559_v0 = vadd.f32 %v3558_v30, %v3557_v17  ;;  %v3564_v1 = vadd.f32 %v3563_v33, %v3562_v23 }
 0x4a7   : > { %v3623_v16 = vsel %vm3005_vm10, %v3545_v52, %v3622_v27 }
 0x4a8   : > { %v3624_v62 = vsel %vm3007_vm11, %v3552_v58, %v3623_v16  ;;  %v3565_v9 = vrot.slane %v3564_v1, 1 }
 0x4a9   : > { %v3625_v46 = vsel %vm3009_vm12, %v3559_v0, %v3624_v62 }
 0x4aa   : > { %v3566_v10 = vadd.f32 %v3565_v9, %v3564_v1 }
 0x4ac   : > { %v3626_v22 = vsel %vm3011_vm13, %v3566_v10, %v3625_v46 }
 0x4ad   : > { %3634 = vst.msk [vmem:[%s5389_s12 + $0x18] sm:$0xff] %vm791_vm0, %v3626_v22 }
 0x4ae PF: > { %s26_s14 = sadd.s32 1, %s4201_s14  }
 0x4af   : > { %p23_p5 = scmp.ge.s32.totalorder %s26_s14, 4  }
 0x4b1   :  { %25 = sbr.rel (!%p23_p5) target bundleno = 4 (0x4), region = 108 }

</bundles_post_ra>
